<compile_context>
chip_gen: v7x
topology: tpu7x:2x2x1
jax: 0.10.0
libtpu: 0.0.40
codegen_flags: <defaults>
</compile_context>

<pallas_src>
import functools

import jax
import jax.numpy as jnp
from jax.experimental import pallas as pl
from jax.experimental.pallas import tpu as pltpu


# ----------------------------------------------------------------------------
# Kernel
# ----------------------------------------------------------------------------
def _ffnn3h_kernel(x_ref,
                   w1_ref, b1_ref,
                   w2_ref, b2_ref,
                   w3_ref, b3_ref,
                   w4_ref, b4_ref,
                   o_ref):
    cdt = w1_ref.dtype   # MXU operand dtype (bf16)
    edt = b1_ref.dtype   # elementwise dtype (bf16 on v6e/v7x, f32 on v5e)

    def act(z_f32, b_ref):
        # sigmoid(z) = 0.5*(tanh(z/2) + 1): single EUP push (no exp + divide).
        z = z_f32.astype(edt) + b_ref[...]
        return (0.5 * (jnp.tanh(0.5 * z) + 1.0)).astype(cdt)

    # Stream x as f32 from HBM; cast to bf16 on the VPU (free filler slot).
    x = x_ref[...].astype(cdt)

    h = act(jnp.dot(x, w1_ref[...], preferred_element_type=jnp.float32), b1_ref)
    h = act(jnp.dot(h, w2_ref[...], preferred_element_type=jnp.float32), b2_ref)
    h = act(jnp.dot(h, w3_ref[...], preferred_element_type=jnp.float32), b3_ref)
    # fc4, no activation; torch.flatten(.., 1) on a 2-D tensor is a no-op.
    out = (jnp.dot(h, w4_ref[...], preferred_element_type=jnp.float32)
           + b4_ref[...].astype(jnp.float32))
    o_ref[...] = out.astype(o_ref.dtype)


# ----------------------------------------------------------------------------
# Parameter packing: bf16 weights + zero-pad hidden widths to multiples of 128
# ----------------------------------------------------------------------------
def _round_up(n, m=128):
    return -(-n // m) * m


def _pad_to(a, rows, cols):
    return jnp.pad(a, ((0, rows - a.shape[0]), (0, cols - a.shape[1])))


def pack_params(params, compute_dtype=jnp.bfloat16, elementwise_dtype=jnp.float32):
    """params = (w1, b1, w2, b2, w3, b3, w4, b4); wK is (in, out), bK is (1, out).

    Hidden widths are zero-padded to multiples of 128 (lane-dense activations).
    Padded hidden units emit sigmoid(0)=0.5, but the matching zero-padded ROWS
    of the next layer's weight cancel them exactly.  (This cancellation relies
    on pack_params being the only source of padded weights.)
    Input/output widths are left unpadded (they are the HBM-streamed tensors).
    """
    w1, b1, w2, b2, w3, b3, w4, b4 = params
    d0 = w1.shape[0]
    d1, d2, d3, d4 = w1.shape[1], w2.shape[1], w3.shape[1], w4.shape[1]
    p1, p2, p3 = _round_up(d1), _round_up(d2), _round_up(d3)

    w1p = _pad_to(w1, d0, p1).astype(compute_dtype)
    w2p = _pad_to(w2, p1, p2).astype(compute_dtype)
    w3p = _pad_to(w3, p2, p3).astype(compute_dtype)
    w4p = _pad_to(w4, p3, d4).astype(compute_dtype)
    b1p = _pad_to(b1, 1, p1).astype(elementwise_dtype)
    b2p = _pad_to(b2, 1, p2).astype(elementwise_dtype)
    b3p = _pad_to(b3, 1, p3).astype(elementwise_dtype)
    b4p = b4.astype(jnp.float32)  # final layer math stays f32
    return (w1p, b1p, w2p, b2p, w3p, b3p, w4p, b4p)


# ----------------------------------------------------------------------------
# Forward wrapper
# ----------------------------------------------------------------------------
# 4096-row f32 tiles: x in ~0.5 MiB, out ~0.25 MiB, a few (4096,128)
# intermediates + ~160 KiB weights -> comfortably inside v5e's 16 MiB scoped
# default and v7x's 64 MiB physical VMEM, while amortizing per-step overhead.
_MAX_BLOCK_B = 4096


def _pick_block_b(B):
    """As few, as large steps as VMEM allows (single step when B <= 4096)."""
    return B if B <= _MAX_BLOCK_B else _MAX_BLOCK_B


@functools.partial(jax.jit, static_argnames=("block_b",))
def ffnn3h_forward(x, packed_params, block_b=None):
    """x: (B, D0) f32; packed_params from pack_params()."""
    w1, b1, w2, b2, w3, b3, w4, b4 = packed_params
    B, D0 = x.shape
    D1, D2, D3, D4 = w1.shape[1], w2.shape[1], w3.shape[1], w4.shape[1]
    out_dtype = x.dtype

    if block_b is None:
        block_b = _pick_block_b(B)
    grid = (pl.cdiv(B, block_b),)
    # NOTE: a partial last block is fine -- the padding rows pass through
    # tanh/sigmoid but their results are dropped on the masked write-back.

    # Constant index_map -> weights/biases stay VMEM-resident across grid
    # steps (Pallas skips the re-DMA when the block index doesn't change).
    full = lambda shape: pl.BlockSpec(shape, lambda i: (0, 0))

    itemsize = jnp.dtype(x.dtype).itemsize
    param_bytes = sum(int(p.size) * jnp.dtype(p.dtype).itemsize
                      for p in packed_params)
    cost = pl.CostEstimate(
        flops=2 * B * (D0 * D1 + D1 * D2 + D2 * D3 + D3 * D4),
        transcendentals=B * (D1 + D2 + D3),
        bytes_accessed=B * D0 * itemsize + B * D4 * 4 + param_bytes,
    )

    return pl.pallas_call(
        _ffnn3h_kernel,
        out_shape=jax.ShapeDtypeStruct((B, D4), out_dtype),
        grid=grid,
        in_specs=[
            pl.BlockSpec((block_b, D0), lambda i: (i, 0)),   # x tile over batch
            full((D0, D1)), full((1, D1)),
            full((D1, D2)), full((1, D2)),
            full((D2, D3)), full((1, D3)),
            full((D3, D4)), full((1, D4)),
        ],
        out_specs=pl.BlockSpec((block_b, D4), lambda i: (i, 0)),
        compiler_params=pltpu.CompilerParams(
            dimension_semantics=("parallel",)),
        cost_estimate=cost,
    )(x, w1, b1, w2, b2, w3, b3, w4, b4)


# ----------------------------------------------------------------------------
# Init + references
# ----------------------------------------------------------------------------
def init_linear(key, fan_in, fan_out, dtype=jnp.float32):
    """torch.nn.Linear-style init: U(-1/sqrt(fan_in), 1/sqrt(fan_in)).
    Weight returned already transposed to (fan_in, fan_out)."""
    kw, kb = jax.random.split(key)
    bound = 1.0 / (fan_in ** 0.5)
    w = jax.random.uniform(kw, (fan_in, fan_out), dtype, minval=-bound, maxval=bound)
    b = jax.random.uniform(kb, (1, fan_out), dtype, minval=-bound, maxval=bound)
    return w, b


def reference_forward_f32(x, params):
    """Pure-f32, unpadded reference (semantics of the PyTorch module)."""
    w1, b1, w2, b2, w3, b3, w4, b4 = params
    h = jax.nn.sigmoid(x @ w1 + b1)
    h = jax.nn.sigmoid(h @ w2 + b2)
    h = jax.nn.sigmoid(h @ w3 + b3)
    out = h @ w4 + b4
    return out.reshape(out.shape[0], -1)  # torch.flatten(., 1) is a no-op on 2-D


def reference_forward_mirrored(x, packed_params):
    """Mirrors the kernel's precision exactly: bf16 MXU operands, f32 accum,
    tanh-form sigmoid in the elementwise dtype."""
    w1, b1, w2, b2, w3, b3, w4, b4 = packed_params
    cdt, edt = w1.dtype, b1.dtype

    def act(z_f32, b):
        z = z_f32.astype(edt) + b
        return (0.5 * (jnp.tanh(0.5 * z) + 1.0)).astype(cdt)

    xc = x.astype(cdt)
    h = act(jnp.dot(xc, w1, preferred_element_type=jnp.float32), b1)
    h = act(jnp.dot(h, w2, preferred_element_type=jnp.float32), b2)
    h = act(jnp.dot(h, w3, preferred_element_type=jnp.float32), b3)
    out = (jnp.dot(h, w4, preferred_element_type=jnp.float32)
           + b4.astype(jnp.float32))
    return out.reshape(out.shape[0], -1)


# ----------------------------------------------------------------------------
# Demo
# ----------------------------------------------------------------------------
if __name__ == "__main__":
    # topology = [input, h1, h2, h3, out]
    topology = [32, 64, 48, 24, 16]
    batch = 256

    key = jax.random.PRNGKey(0)
    kx, k1, k2, k3, k4 = jax.random.split(key, 5)

    x = jax.random.normal(kx, (batch, topology[0]), jnp.float32)
    w1, b1 = init_linear(k1, topology[0], topology[1])
    w2, b2 = init_linear(k2, topology[1], topology[2])
    w3, b3 = init_linear(k3, topology[2], topology[3])
    w4, b4 = init_linear(k4, topology[3], topology[4])
    params = (w1, b1, w2, b2, w3, b3, w4, b4)

    # Generation-aware elementwise dtype: bf16 VPU/EUP exists on v6e/v7x only.
    try:
        kind = jax.devices()[0].device_kind.lower()
    except Exception:
        kind = ""
    use_bf16_elementwise = ("v6" in kind) or ("v7" in kind)
    ew_dtype = jnp.bfloat16 if use_bf16_elementwise else jnp.float32

    packed = pack_params(params, compute_dtype=jnp.bfloat16,
                         elementwise_dtype=ew_dtype)

    out = ffnn3h_forward(x, packed)
    out = jax.block_until_ready(out)
    assert out.shape == (batch, topology[4])
    assert bool(jnp.all(jnp.isfinite(out)))

    # Tight check vs. a reference that mirrors the kernel's precision.
    ref_m = reference_forward_mirrored(x, packed)
    assert jnp.allclose(out, ref_m, atol=2e-2, rtol=2e-2), \
        "mismatch vs mirrored-precision reference"

    # Loose check vs. the original full-f32, unpadded module semantics.
    ref_f32 = reference_forward_f32(x, params)
    assert jnp.allclose(out, ref_f32, atol=5e-2, rtol=5e-2), \
        "mismatch vs f32 reference"

    print("KERNEL_OK")
</pallas_src>

<mosaic_0001>
module attributes {stable_mosaic.version = 11 : i64} {
  func.func @_ffnn3h_kernel(%arg0: i32, %arg1: memref<256x32xf32, #tpu.memory_space<vmem>>, %arg2: memref<32x128xbf16, #tpu.memory_space<vmem>>, %arg3: memref<1x128xf32, #tpu.memory_space<vmem>>, %arg4: memref<128x128xbf16, #tpu.memory_space<vmem>>, %arg5: memref<1x128xf32, #tpu.memory_space<vmem>>, %arg6: memref<128x128xbf16, #tpu.memory_space<vmem>>, %arg7: memref<1x128xf32, #tpu.memory_space<vmem>>, %arg8: memref<128x16xbf16, #tpu.memory_space<vmem>>, %arg9: memref<1x16xf32, #tpu.memory_space<vmem>>, %arg10: memref<256x16xf32, #tpu.memory_space<vmem>>) attributes {dimension_semantics = [#tpu.dimension_semantics<parallel>], iteration_bounds = array<i64: 1>, scalar_prefetch = 0 : i64, scratch_operands = 0 : i64, tpu.core_type = #tpu.core_type<tc>, window_params = [{transform_indices = @transform_0, window_bounds = array<i64: 256, 32>}, {pipeline_mode = #tpu.pipeline_mode<synchronous>, transform_indices = @transform_1, window_bounds = array<i64: 32, 128>}, {pipeline_mode = #tpu.pipeline_mode<synchronous>, transform_indices = @transform_2, window_bounds = array<i64: 1, 128>}, {pipeline_mode = #tpu.pipeline_mode<synchronous>, transform_indices = @transform_3, window_bounds = array<i64: 128, 128>}, {pipeline_mode = #tpu.pipeline_mode<synchronous>, transform_indices = @transform_4, window_bounds = array<i64: 1, 128>}, {pipeline_mode = #tpu.pipeline_mode<synchronous>, transform_indices = @transform_5, window_bounds = array<i64: 128, 128>}, {pipeline_mode = #tpu.pipeline_mode<synchronous>, transform_indices = @transform_6, window_bounds = array<i64: 1, 128>}, {pipeline_mode = #tpu.pipeline_mode<synchronous>, transform_indices = @transform_7, window_bounds = array<i64: 128, 16>}, {pipeline_mode = #tpu.pipeline_mode<synchronous>, transform_indices = @transform_8, window_bounds = array<i64: 1, 16>}, {transform_indices = @transform_9, window_bounds = array<i64: 256, 16>}]} {
    %c0 = arith.constant 0 : index
    %c0_0 = arith.constant 0 : index
    %0 = vector.load %arg1[%c0, %c0_0] : memref<256x32xf32, #tpu.memory_space<vmem>>, vector<256x32xf32>
    %1 = arith.truncf %0 : vector<256x32xf32> to vector<256x32xbf16>
    %c0_1 = arith.constant 0 : index
    %c0_2 = arith.constant 0 : index
    %2 = vector.load %arg2[%c0_1, %c0_2] : memref<32x128xbf16, #tpu.memory_space<vmem>>, vector<32x128xbf16>
    %cst = arith.constant dense<0.000000e+00> : vector<256x128xf32>
    %3 = tpu.matmul %1, %2, %cst {dimension_numbers = #tpu.dot_dimension_numbers<[1], [0], [0], [1], [0, 0, 1, 1], [], []>} : vector<256x32xbf16>, vector<32x128xbf16>, vector<256x128xf32> -> vector<256x128xf32>
    %c0_3 = arith.constant 0 : index
    %c0_4 = arith.constant 0 : index
    %4 = vector.load %arg3[%c0_3, %c0_4] : memref<1x128xf32, #tpu.memory_space<vmem>>, vector<1x128xf32>
    %5 = vector.broadcast %4 : vector<1x128xf32> to vector<256x128xf32>
    %6 = arith.addf %3, %5 : vector<256x128xf32>
    %cst_5 = arith.constant 5.000000e-01 : f32
    %7 = vector.broadcast %cst_5 : f32 to vector<256x128xf32>
    %8 = arith.mulf %7, %6 : vector<256x128xf32>
    %9 = math.tanh %8 : vector<256x128xf32>
    %cst_6 = arith.constant 1.000000e+00 : f32
    %10 = vector.broadcast %cst_6 : f32 to vector<256x128xf32>
    %11 = arith.addf %9, %10 : vector<256x128xf32>
    %cst_7 = arith.constant 5.000000e-01 : f32
    %12 = vector.broadcast %cst_7 : f32 to vector<256x128xf32>
    %13 = arith.mulf %12, %11 : vector<256x128xf32>
    %14 = arith.truncf %13 : vector<256x128xf32> to vector<256x128xbf16>
    %c0_8 = arith.constant 0 : index
    %c0_9 = arith.constant 0 : index
    %15 = vector.load %arg4[%c0_8, %c0_9] : memref<128x128xbf16, #tpu.memory_space<vmem>>, vector<128x128xbf16>
    %cst_10 = arith.constant dense<0.000000e+00> : vector<256x128xf32>
    %16 = tpu.matmul %14, %15, %cst_10 {dimension_numbers = #tpu.dot_dimension_numbers<[1], [0], [0], [1], [0, 0, 1, 1], [], []>} : vector<256x128xbf16>, vector<128x128xbf16>, vector<256x128xf32> -> vector<256x128xf32>
    %c0_11 = arith.constant 0 : index
    %c0_12 = arith.constant 0 : index
    %17 = vector.load %arg5[%c0_11, %c0_12] : memref<1x128xf32, #tpu.memory_space<vmem>>, vector<1x128xf32>
    %18 = vector.broadcast %17 : vector<1x128xf32> to vector<256x128xf32>
    %19 = arith.addf %16, %18 : vector<256x128xf32>
    %cst_13 = arith.constant 5.000000e-01 : f32
    %20 = vector.broadcast %cst_13 : f32 to vector<256x128xf32>
    %21 = arith.mulf %20, %19 : vector<256x128xf32>
    %22 = math.tanh %21 : vector<256x128xf32>
    %cst_14 = arith.constant 1.000000e+00 : f32
    %23 = vector.broadcast %cst_14 : f32 to vector<256x128xf32>
    %24 = arith.addf %22, %23 : vector<256x128xf32>
    %cst_15 = arith.constant 5.000000e-01 : f32
    %25 = vector.broadcast %cst_15 : f32 to vector<256x128xf32>
    %26 = arith.mulf %25, %24 : vector<256x128xf32>
    %27 = arith.truncf %26 : vector<256x128xf32> to vector<256x128xbf16>
    %c0_16 = arith.constant 0 : index
    %c0_17 = arith.constant 0 : index
    %28 = vector.load %arg6[%c0_16, %c0_17] : memref<128x128xbf16, #tpu.memory_space<vmem>>, vector<128x128xbf16>
    %cst_18 = arith.constant dense<0.000000e+00> : vector<256x128xf32>
    %29 = tpu.matmul %27, %28, %cst_18 {dimension_numbers = #tpu.dot_dimension_numbers<[1], [0], [0], [1], [0, 0, 1, 1], [], []>} : vector<256x128xbf16>, vector<128x128xbf16>, vector<256x128xf32> -> vector<256x128xf32>
    %c0_19 = arith.constant 0 : index
    %c0_20 = arith.constant 0 : index
    %30 = vector.load %arg7[%c0_19, %c0_20] : memref<1x128xf32, #tpu.memory_space<vmem>>, vector<1x128xf32>
    %31 = vector.broadcast %30 : vector<1x128xf32> to vector<256x128xf32>
    %32 = arith.addf %29, %31 : vector<256x128xf32>
    %cst_21 = arith.constant 5.000000e-01 : f32
    %33 = vector.broadcast %cst_21 : f32 to vector<256x128xf32>
    %34 = arith.mulf %33, %32 : vector<256x128xf32>
    %35 = math.tanh %34 : vector<256x128xf32>
    %cst_22 = arith.constant 1.000000e+00 : f32
    %36 = vector.broadcast %cst_22 : f32 to vector<256x128xf32>
    %37 = arith.addf %35, %36 : vector<256x128xf32>
    %cst_23 = arith.constant 5.000000e-01 : f32
    %38 = vector.broadcast %cst_23 : f32 to vector<256x128xf32>
    %39 = arith.mulf %38, %37 : vector<256x128xf32>
    %40 = arith.truncf %39 : vector<256x128xf32> to vector<256x128xbf16>
    %c0_24 = arith.constant 0 : index
    %c0_25 = arith.constant 0 : index
    %41 = vector.load %arg8[%c0_24, %c0_25] : memref<128x16xbf16, #tpu.memory_space<vmem>>, vector<128x16xbf16>
    %cst_26 = arith.constant dense<0.000000e+00> : vector<256x16xf32>
    %42 = tpu.matmul %40, %41, %cst_26 {dimension_numbers = #tpu.dot_dimension_numbers<[1], [0], [0], [1], [0, 0, 1, 1], [], []>} : vector<256x128xbf16>, vector<128x16xbf16>, vector<256x16xf32> -> vector<256x16xf32>
    %c0_27 = arith.constant 0 : index
    %c0_28 = arith.constant 0 : index
    %43 = vector.load %arg9[%c0_27, %c0_28] : memref<1x16xf32, #tpu.memory_space<vmem>>, vector<1x16xf32>
    %44 = vector.broadcast %43 : vector<1x16xf32> to vector<256x16xf32>
    %45 = arith.addf %42, %44 : vector<256x16xf32>
    %c0_29 = arith.constant 0 : index
    %c0_30 = arith.constant 0 : index
    %46 = vector.load %arg10[%c0_29, %c0_30] : memref<256x16xf32, #tpu.memory_space<vmem>>, vector<256x16xf32>
    tpu.vector_store %arg10[%c0_29, %c0_30], %45 {strides = array<i32>} : memref<256x16xf32, #tpu.memory_space<vmem>>, vector<256x16xf32>,
    return
  }
  func.func @transform_0(%arg0: i32) -> (i32, i32) {
    %c0_i32 = arith.constant 0 : i32
    %c0_i32_0 = arith.constant 0 : i32
    return %arg0, %c0_i32 : i32, i32
  }
  func.func @transform_1(%arg0: i32) -> (i32, i32) {
    %c0_i32 = arith.constant 0 : i32
    %c0_i32_0 = arith.constant 0 : i32
    %c0_i32_1 = arith.constant 0 : i32
    return %c0_i32, %c0_i32_0 : i32, i32
  }
  func.func @transform_2(%arg0: i32) -> (i32, i32) {
    %c0_i32 = arith.constant 0 : i32
    %c0_i32_0 = arith.constant 0 : i32
    %c0_i32_1 = arith.constant 0 : i32
    return %c0_i32, %c0_i32_0 : i32, i32
  }
  func.func @transform_3(%arg0: i32) -> (i32, i32) {
    %c0_i32 = arith.constant 0 : i32
    %c0_i32_0 = arith.constant 0 : i32
    %c0_i32_1 = arith.constant 0 : i32
    return %c0_i32, %c0_i32_0 : i32, i32
  }
  func.func @transform_4(%arg0: i32) -> (i32, i32) {
    %c0_i32 = arith.constant 0 : i32
    %c0_i32_0 = arith.constant 0 : i32
    %c0_i32_1 = arith.constant 0 : i32
    return %c0_i32, %c0_i32_0 : i32, i32
  }
  func.func @transform_5(%arg0: i32) -> (i32, i32) {
    %c0_i32 = arith.constant 0 : i32
    %c0_i32_0 = arith.constant 0 : i32
    %c0_i32_1 = arith.constant 0 : i32
    return %c0_i32, %c0_i32_0 : i32, i32
  }
  func.func @transform_6(%arg0: i32) -> (i32, i32) {
    %c0_i32 = arith.constant 0 : i32
    %c0_i32_0 = arith.constant 0 : i32
    %c0_i32_1 = arith.constant 0 : i32
    return %c0_i32, %c0_i32_0 : i32, i32
  }
  func.func @transform_7(%arg0: i32) -> (i32, i32) {
    %c0_i32 = arith.constant 0 : i32
    %c0_i32_0 = arith.constant 0 : i32
    %c0_i32_1 = arith.constant 0 : i32
    return %c0_i32, %c0_i32_0 : i32, i32
  }
  func.func @transform_8(%arg0: i32) -> (i32, i32) {
    %c0_i32 = arith.constant 0 : i32
    %c0_i32_0 = arith.constant 0 : i32
    %c0_i32_1 = arith.constant 0 : i32
    return %c0_i32, %c0_i32_0 : i32, i32
  }
  func.func @transform_9(%arg0: i32) -> (i32, i32) {
    %c0_i32 = arith.constant 0 : i32
    %c0_i32_0 = arith.constant 0 : i32
    return %arg0, %c0_i32 : i32, i32
  }
}

</mosaic_0001>

<bundles_post_ra>
// kernel: ffnn3h_forward.1
= control target key start
LH: loop header
LB: loop body
LE: loop exit
PB: predicated region body
PF: predicated region fallthrough
CT: control target
= control target key end

     0   :  { %vm104_vm0 = vcmask 261120   ;;  %vm1442_vm1 = vcmask 130048   ;;  %s2569_s1 = inlined_call_operand.vmem [shape: bf16[32,128], index: 1, kind: input, shape index: {}]   ;;  %s2570_s0 = inlined_call_operand.vmem [shape: f32[256,32], index: 0, kind: input, shape index: {}]   ;;  %s2571_s3 = inlined_call_operand.vmem [shape: bf16[128,128], index: 3, kind: input, shape index: {}]   ;;  %s2572_s5 = inlined_call_operand.vmem [shape: bf16[128,128], index: 5, kind: input, shape index: {}]   ;;  %s2573_s2 = inlined_call_operand.vmem [shape: f32[1,128], index: 2, kind: input, shape index: {}]   ;;  %s2574_s7 = inlined_call_operand.vmem [shape: bf16[128,16], index: 7, kind: input, shape index: {}]   ;;  %s2575_s4 = inlined_call_operand.vmem [shape: f32[1,128], index: 4, kind: input, shape index: {}]   ;;  %s2576_s6 = inlined_call_operand.vmem [shape: f32[1,128], index: 6, kind: input, shape index: {}]   ;;  %s2577_s8 = inlined_call_operand.vmem [shape: f32[1,16], index: 8, kind: input, shape index: {}]   ;;  %s2578_s9 = inlined_call_operand.vmem [shape: f32[256,16], index: 9, kind: output, shape index: {}]  }
   0x1   :  { %v1811_v0 = vld [vmem:[%s2569_s1] sm:$0xff]   ;;  %v1812_v1 = vld [vmem:[%s2569_s1 + $0x8] sm:$0xff]   ;;  %v35_v5 = vld [vmem:[%s2570_s0 + $0x10] sm:$0xff] }
   0x2   :  { %1615 = vmatprep.subr.bf16.mxu0 %v1811_v0  ;;  %v33_v2 = vld [vmem:[%s2570_s0] sm:$0xff]  ;;  %v34_v3 = vld [vmem:[%s2570_s0 + $0x8] sm:$0xff]  ;;  %v36_v6 = vld [vmem:[%s2570_s0 + $0x18] sm:$0xff] }
   0x3   :  { %1616 = vmatpush3.bf16.msra.mxu0 %v1811_v0  ;;  %v65_v4 = vpack.c.bf16 %v34_v3, %v33_v2  ;;  %v37_v7 = vld [vmem:[%s2570_s0 + $0x20] sm:$0xff]  ;;  %v38_v8 = vld [vmem:[%s2570_s0 + $0x28] sm:$0xff]  ;;  %v66_v9 = vpack.c.bf16 %v36_v6, %v35_v5  ;;  %v39_v11 = vld [vmem:[%s2570_s0 + $0x30] sm:$0xff] }
   0x4   :  { %1617 = vmatprep.subr.bf16.mxu0 %v1812_v1  ;;  %v67_v10 = vpack.c.bf16 %v38_v8, %v37_v7  ;;  %v40_v12 = vld [vmem:[%s2570_s0 + $0x38] sm:$0xff]  ;;  %v41_v13 = vld [vmem:[%s2570_s0 + $0x40] sm:$0xff]  ;;  %v42_v14 = vld [vmem:[%s2570_s0 + $0x48] sm:$0xff] }
   0x5   :  { %1619 = vmatprep.mubr.msk.bf16.mxu0 %vm104_vm0, %v65_v4  ;;  %v1813_v15 = vld [vmem:[%s2571_s3] sm:$0xff]   ;;  %v68_v16 = vpack.c.bf16 %v40_v12, %v39_v11  ;;  %v1814_v17 = vld [vmem:[%s2571_s3 + $0x8] sm:$0xff]   ;;  %v69_v18 = vpack.c.bf16 %v42_v14, %v41_v13  ;;  %v43_v19 = vld [vmem:[%s2570_s0 + $0x50] sm:$0xff] }
   0x6   :  { %1651 = vmatprep.subr.bf16.mxu1 %v1813_v15  ;;  %v44_v20 = vld [vmem:[%s2570_s0 + $0x58] sm:$0xff]  ;;  %v45_v21 = vld [vmem:[%s2570_s0 + $0x60] sm:$0xff]  ;;  %v46_v22 = vld [vmem:[%s2570_s0 + $0x68] sm:$0xff] }
   0x7   :  { %1618 = vmatpush3.bf16.msra.mxu0 %v1812_v1  ;;  %1652 = vmatpush3.bf16.msra.mxu1 %v1813_v15  ;;  %v70_v23 = vpack.c.bf16 %v44_v20, %v43_v19  ;;  %v71_v24 = vpack.c.bf16 %v46_v22, %v45_v21  ;;  %v47_v25 = vld [vmem:[%s2570_s0 + $0x70] sm:$0xff]  ;;  %v48_v26 = vld [vmem:[%s2570_s0 + $0x78] sm:$0xff]  ;;  %v49_v27 = vld [vmem:[%s2570_s0 + $0x80] sm:$0xff] }
   0x8   :  { %1653 = vmatprep.subr.bf16.mxu1 %v1814_v17  ;;  %v50_v28 = vld [vmem:[%s2570_s0 + $0x88] sm:$0xff]  ;;  %v72_v29 = vpack.c.bf16 %v48_v26, %v47_v25  ;;  %v51_v31 = vld [vmem:[%s2570_s0 + $0x90] sm:$0xff]  ;;  %v52_v32 = vld [vmem:[%s2570_s0 + $0x98] sm:$0xff] }
   0x9   :  { %v73_v30 = vpack.c.bf16 %v50_v28, %v49_v27  ;;  %v53_v33 = vld [vmem:[%s2570_s0 + $0xa0] sm:$0xff]  ;;  %v54_v34 = vld [vmem:[%s2570_s0 + $0xa8] sm:$0xff]  ;;  %v74_v35 = vpack.c.bf16 %v52_v32, %v51_v31  ;;  %v55_v37 = vld [vmem:[%s2570_s0 + $0xb0] sm:$0xff] }
   0xa   :  { %1620 = vmatmul.mubr.msk.bf16.vlgmr.msra.gmra.mrb[0].mxu0 %vm104_vm0, %v66_v9  ;;  %v75_v36 = vpack.c.bf16 %v54_v34, %v53_v33  ;;  %v56_v38 = vld [vmem:[%s2570_s0 + $0xb8] sm:$0xff]  ;;  %v57_v39 = vld [vmem:[%s2570_s0 + $0xc0] sm:$0xff]  ;;  %v58_v40 = vld [vmem:[%s2570_s0 + $0xc8] sm:$0xff] }
   0xb   :  { %1623 = vmatprep.mubr.msk.bf16.mxu0 %vm104_vm0, %v67_v10  ;;  %1654 = vmatpush3.bf16.msra.mxu1 %v1814_v17  ;;  %v76_v41 = vpack.c.bf16 %v56_v38, %v55_v37  ;;  %v77_v42 = vpack.c.bf16 %v58_v40, %v57_v39  ;;  %v59_v43 = vld [vmem:[%s2570_s0 + $0xd0] sm:$0xff]  ;;  %v60_v44 = vld [vmem:[%s2570_s0 + $0xd8] sm:$0xff]  ;;  %v61_v45 = vld [vmem:[%s2570_s0 + $0xe0] sm:$0xff] }
   0xc   :  { %v62_v46 = vld [vmem:[%s2570_s0 + $0xe8] sm:$0xff]  ;;  %v78_v47 = vpack.c.bf16 %v60_v44, %v59_v43  ;;  %v63_v49 = vld [vmem:[%s2570_s0 + $0xf0] sm:$0xff]  ;;  %v64_v50 = vld [vmem:[%s2570_s0 + $0xf8] sm:$0xff] }
   0xd   :  { %v79_v48 = vpack.c.bf16 %v62_v46, %v61_v45  ;;  %v80_v51 = vpack.c.bf16 %v64_v50, %v63_v49  ;;  %v1815_v52 = vld [vmem:[%s2571_s3 + $0x10] sm:$0xff]   ;;  %v1816_v53 = vld [vmem:[%s2571_s3 + $0x18] sm:$0xff]   ;;  %v1817_v54 = vld [vmem:[%s2571_s3 + $0x20] sm:$0xff]  }
   0xe   :  { %1655 = vmatprep.subr.bf16.mxu1 %v1815_v52  ;;  %v1818_v55 = vld [vmem:[%s2571_s3 + $0x28] sm:$0xff]   ;;  %v1819_v56 = vld [vmem:[%s2571_s3 + $0x30] sm:$0xff]   ;;  %v1820_v57 = vld [vmem:[%s2571_s3 + $0x38] sm:$0xff]  }
   0xf   :  { %1656 = vmatpush3.bf16.msra.mxu1 %v1815_v52  ;;  %v1821_v58 = vld [vmem:[%s2572_s5] sm:$0xff]   ;;  %v1822_v59 = vld [vmem:[%s2572_s5 + $0x8] sm:$0xff]   ;;  %v1823_v60 = vld [vmem:[%s2572_s5 + $0x10] sm:$0xff]  }
  0x10   :  { %1657 = vmatprep.subr.bf16.mxu1 %v1816_v53  ;;  %1699 = vmatprep.subr.bf16.mxu0 %v1821_v58  ;;  %v1824_v61 = vld [vmem:[%s2572_s5 + $0x18] sm:$0xff]   ;;  %v1825_v62 = vld [vmem:[%s2572_s5 + $0x20] sm:$0xff]  }
  0x11   :  { %1700 = vmatpush3.bf16.msra.mxu0 %v1821_v58  ;;  %v2239_v63 = vld [vmem:[%s2573_s2] ss:$0 sm:$0xff] }
  0x12   :  { %1624 = vmatmul.mubr.msk.bf16.gmra.mrb[4].mxu0 %vm104_vm0, %v68_v16  ;;  %1701 = vmatprep.subr.bf16.mxu0 %v1822_v59 }
  0x13   :  { %1627 = vmatprep.mubr.msk.bf16.mxu0 %vm104_vm0, %v69_v18  ;;  %1658 = vmatpush3.bf16.msra.mxu1 %v1816_v53 }
  0x14   :  { %1659 = vmatprep.subr.bf16.mxu1 %v1817_v54 }
  0x15   :  { %1702 = vmatpush3.bf16.msra.mxu0 %v1822_v59 }
  0x16   :  { %1703 = vmatprep.subr.bf16.mxu0 %v1823_v60 }
  0x17   :  { %1660 = vmatpush3.bf16.msra.mxu1 %v1817_v54 }
  0x18   :  { %1661 = vmatprep.subr.bf16.mxu1 %v1818_v55 }
  0x19   :  { %1704 = vmatpush3.bf16.msra.mxu0 %v1823_v60 }
  0x1a   :  { %1628 = vmatmul.mubr.msk.bf16.gmra.mrb[8].mxu0 %vm104_vm0, %v70_v23  ;;  %1705 = vmatprep.subr.bf16.mxu0 %v1824_v61 }
  0x1b   :  { %1631 = vmatprep.mubr.msk.bf16.mxu0 %vm104_vm0, %v71_v24  ;;  %1662 = vmatpush3.bf16.msra.mxu1 %v1818_v55 }
  0x1c   :  { %1663 = vmatprep.subr.bf16.mxu1 %v1819_v56 }
  0x1d   :  { %1706 = vmatpush3.bf16.msra.mxu0 %v1824_v61 }
  0x1e   :  { %1707 = vmatprep.subr.bf16.mxu0 %v1825_v62 }
  0x1f   :  { %1664 = vmatpush3.bf16.msra.mxu1 %v1819_v56 }
  0x20   :  { %1665 = vmatprep.subr.bf16.mxu1 %v1820_v57 }
  0x21   :  { %1708 = vmatpush3.bf16.msra.mxu0 %v1825_v62 }
  0x22   :  { %1632 = vmatmul.mubr.msk.bf16.gmra.mrb[12].mxu0 %vm104_vm0, %v72_v29 }
  0x23   :  { %1635 = vmatprep.mubr.msk.bf16.mxu0 %vm104_vm0, %v73_v30  ;;  %1666 = vmatpush3.bf16.msra.mxu1 %v1820_v57 }
  0x2a   :  { %1636 = vmatmul.mubr.msk.bf16.gmra.mrb[16].mxu0 %vm104_vm0, %v74_v35 }
  0x2b   :  { %1639 = vmatprep.mubr.msk.bf16.mxu0 %vm104_vm0, %v75_v36 }
  0x32   :  { %1640 = vmatmul.mubr.msk.bf16.gmra.mrb[20].mxu0 %vm104_vm0, %v76_v41 }
  0x33   :  { %1643 = vmatprep.mubr.msk.bf16.mxu0 %vm104_vm0, %v77_v42 }
  0x3a   :  { %1644 = vmatmul.mubr.msk.bf16.gmra.mrb[24].mxu0 %vm104_vm0, %v78_v47 }
  0x3b   :  { %1647 = vmatprep.mubr.msk.bf16.mxu0 %vm104_vm0, %v79_v48 }
  0x42   :  { %1648 = vmatmul.mubr.msk.bf16.gmra.mrb[28].mxu0 %vm104_vm0, %v80_v51 }
  0xdd   :  { %v1621_v0 = vpop.f32.mrb[0].mxu0 }
  0xde   :  { %v196_v1 = vadd.f32 %v1621_v0, %v2239_v63  ;;  %v187_v2 = vpop.f32.mrb[1].mxu0 }
  0xdf   :  { %v188_v3 = vadd.f32 %v2239_v63, %v187_v2  ;;  %v1622_v4 = vpop.f32.mrb[2].mxu0 }
  0xe0   :  { %v316_v5 = vmul.f32 0.5, %v196_v1  ;;  %v199_v6 = vadd.f32 %v1622_v4, %v2239_v63  ;;  %v190_v7 = vpop.f32.mrb[3].mxu0 }
  0xe1   :  { %v314_v8 = vmul.f32 0.5, %v188_v3  ;;  %v191_v9 = vadd.f32 %v2239_v63, %v190_v7 }
  0xe2   :  { %1837 = vtanh.f32 %v316_v5  ;;  %v317_v10 = vmul.f32 0.5, %v199_v6 }
  0xe3   :  { %1839 = vtanh.f32 %v314_v8  ;;  %v315_v11 = vmul.f32 0.5, %v191_v9 }
  0xe4   :  { %1841 = vtanh.f32 %v317_v10 }
  0xe5   :  { %1843 = vtanh.f32 %v315_v11  ;;  %v1625_v12 = vpop.f32.mrb[4].mxu0 }
  0xe6   :  { %v212_v13 = vadd.f32 %v1625_v12, %v2239_v63  ;;  %v203_v14 = vpop.f32.mrb[5].mxu0 }
  0xe7   :  { %v204_v15 = vadd.f32 %v2239_v63, %v203_v14  ;;  %v1626_v16 = vpop.f32.mrb[6].mxu0 }
  0xe8   :  { %v320_v17 = vmul.f32 0.5, %v212_v13  ;;  %v215_v18 = vadd.f32 %v1626_v16, %v2239_v63  ;;  %v206_v19 = vpop.f32.mrb[7].mxu0 }
  0xe9   :  { %v318_v20 = vmul.f32 0.5, %v204_v15  ;;  %v207_v21 = vadd.f32 %v2239_v63, %v206_v19 }
  0xea   :  { %1845 = vtanh.f32 %v320_v17  ;;  %v321_v22 = vmul.f32 0.5, %v215_v18 }
  0xeb   :  { %1847 = vtanh.f32 %v318_v20  ;;  %v319_v23 = vmul.f32 0.5, %v207_v21 }
  0xec   :  { %v1838_v24 = vpop.eup %1837  ;;  %1849 = vtanh.f32 %v321_v22 }
  0xed   :  { %v1840_v25 = vpop.eup %1839  ;;  %v380_v26 = vadd.f32 1.0, %v1838_v24  ;;  %1851 = vtanh.f32 %v319_v23  ;;  %v1629_v27 = vpop.f32.mrb[8].mxu0 }
  0xee   :  { %v1842_v28 = vpop.eup %1841  ;;  %v228_v29 = vadd.f32 %v1629_v27, %v2239_v63  ;;  %v219_v30 = vpop.f32.mrb[9].mxu0  ;;  %v378_v31 = vadd.f32 1.0, %v1840_v25 }
  0xef   :  { %v1844_v32 = vpop.eup %1843  ;;  %v381_v33 = vadd.f32 1.0, %v1842_v28  ;;  %v220_v34 = vadd.f32 %v2239_v63, %v219_v30  ;;  %v1630_v35 = vpop.f32.mrb[10].mxu0  ;;  %v412_v40 = vmul.f32 0.5, %v380_v26 }
  0xf0   :  { %v324_v36 = vmul.f32 0.5, %v228_v29  ;;  %v231_v37 = vadd.f32 %v1630_v35, %v2239_v63  ;;  %v222_v38 = vpop.f32.mrb[11].mxu0  ;;  %v379_v39 = vadd.f32 1.0, %v1844_v32  ;;  %v410_v45 = vmul.f32 0.5, %v378_v31 }
  0xf1   :  { %v413_v41 = vmul.f32 0.5, %v381_v33  ;;  %v322_v42 = vmul.f32 0.5, %v220_v34  ;;  %v223_v43 = vadd.f32 %v2239_v63, %v222_v38 }
  0xf2   :  { %1853 = vtanh.f32 %v324_v36  ;;  %v325_v44 = vmul.f32 0.5, %v231_v37  ;;  %v411_v46 = vmul.f32 0.5, %v379_v39 }
  0xf3   :  { %1855 = vtanh.f32 %v322_v42  ;;  %v323_v47 = vmul.f32 0.5, %v223_v43  ;;  %v443_v48 = vpack.c.bf16 %v413_v41, %v412_v40 }
  0xf4   :  { %v1846_v49 = vpop.eup %1845  ;;  %1857 = vtanh.f32 %v325_v44  ;;  %v442_v50 = vpack.c.bf16 %v411_v46, %v410_v45 }
  0xf5   :  { %v1848_v51 = vpop.eup %1847  ;;  %v384_v52 = vadd.f32 1.0, %v1846_v49  ;;  %1859 = vtanh.f32 %v323_v47  ;;  %v1633_v53 = vpop.f32.mrb[12].mxu0 }
  0xf6   :  { %v1850_v54 = vpop.eup %1849  ;;  %v382_v55 = vadd.f32 1.0, %v1848_v51  ;;  %v244_v56 = vadd.f32 %v1633_v53, %v2239_v63  ;;  %v235_v57 = vpop.f32.mrb[13].mxu0  ;;  %1667 = vmatprep.mubr.bf16.mxu1 %v442_v50 }
  0xf7   :  { %v1852_v58 = vpop.eup %1851  ;;  %v385_v59 = vadd.f32 1.0, %v1850_v54  ;;  %v236_v60 = vadd.f32 %v2239_v63, %v235_v57  ;;  %v1634_v61 = vpop.f32.mrb[14].mxu0  ;;  %1668 = vmatmul.mubr.bf16.vlgmr.msra.gmra.mrb[0].mxu1 %v443_v48  ;;  %v416_v3 = vmul.f32 0.5, %v384_v52 }
  0xf8   :  { %v383_v62 = vadd.f32 1.0, %v1852_v58  ;;  %v328_v0 = vmul.f32 0.5, %v244_v56  ;;  %v247_v1 = vadd.f32 %v1634_v61, %v2239_v63  ;;  %v238_v2 = vpop.f32.mrb[15].mxu0  ;;  %v414_v7 = vmul.f32 0.5, %v382_v55 }
  0xf9   :  { %v417_v4 = vmul.f32 0.5, %v385_v59  ;;  %v326_v5 = vmul.f32 0.5, %v236_v60  ;;  %v239_v6 = vadd.f32 %v2239_v63, %v238_v2 }
  0xfa   :  { %v415_v8 = vmul.f32 0.5, %v383_v62  ;;  %1861 = vtanh.f32 %v328_v0  ;;  %v329_v9 = vmul.f32 0.5, %v247_v1 }
  0xfb   :  { %1863 = vtanh.f32 %v326_v5  ;;  %v327_v10 = vmul.f32 0.5, %v239_v6  ;;  %v445_v11 = vpack.c.bf16 %v417_v4, %v416_v3 }
  0xfc   :  { %v1854_v12 = vpop.eup %1853  ;;  %1865 = vtanh.f32 %v329_v9  ;;  %v444_v13 = vpack.c.bf16 %v415_v8, %v414_v7 }
  0xfd   :  { %v1856_v14 = vpop.eup %1855  ;;  %v388_v15 = vadd.f32 1.0, %v1854_v12  ;;  %1867 = vtanh.f32 %v327_v10  ;;  %v1637_v16 = vpop.f32.mrb[16].mxu0 }
  0xfe   :  { %v1858_v17 = vpop.eup %1857  ;;  %v386_v18 = vadd.f32 1.0, %v1856_v14  ;;  %v260_v19 = vadd.f32 %v1637_v16, %v2239_v63  ;;  %v251_v20 = vpop.f32.mrb[17].mxu0  ;;  %1671 = vmatprep.mubr.bf16.mxu1 %v444_v13 }
  0xff   :  { %v1860_v21 = vpop.eup %1859  ;;  %v389_v22 = vadd.f32 1.0, %v1858_v17  ;;  %v252_v23 = vadd.f32 %v2239_v63, %v251_v20  ;;  %v1638_v24 = vpop.f32.mrb[18].mxu0  ;;  %1672 = vmatmul.mubr.bf16.gmra.mrb[4].mxu1 %v445_v11  ;;  %v420_v29 = vmul.f32 0.5, %v388_v15 }
 0x100   :  { %v387_v25 = vadd.f32 1.0, %v1860_v21  ;;  %v332_v26 = vmul.f32 0.5, %v260_v19  ;;  %v263_v27 = vadd.f32 %v1638_v24, %v2239_v63  ;;  %v254_v28 = vpop.f32.mrb[19].mxu0  ;;  %v418_v33 = vmul.f32 0.5, %v386_v18 }
 0x101   :  { %v421_v30 = vmul.f32 0.5, %v389_v22  ;;  %v330_v31 = vmul.f32 0.5, %v252_v23  ;;  %v255_v32 = vadd.f32 %v2239_v63, %v254_v28 }
 0x102   :  { %v419_v34 = vmul.f32 0.5, %v387_v25  ;;  %1869 = vtanh.f32 %v332_v26  ;;  %v333_v35 = vmul.f32 0.5, %v263_v27 }
 0x103   :  { %1871 = vtanh.f32 %v330_v31  ;;  %v331_v36 = vmul.f32 0.5, %v255_v32  ;;  %v447_v37 = vpack.c.bf16 %v421_v30, %v420_v29 }
 0x104   :  { %v1862_v38 = vpop.eup %1861  ;;  %1873 = vtanh.f32 %v333_v35  ;;  %v446_v39 = vpack.c.bf16 %v419_v34, %v418_v33 }
 0x105   :  { %v1864_v40 = vpop.eup %1863  ;;  %v392_v41 = vadd.f32 1.0, %v1862_v38  ;;  %1875 = vtanh.f32 %v331_v36  ;;  %v1641_v42 = vpop.f32.mrb[20].mxu0 }
 0x106   :  { %v1866_v43 = vpop.eup %1865  ;;  %v390_v44 = vadd.f32 1.0, %v1864_v40  ;;  %v276_v45 = vadd.f32 %v1641_v42, %v2239_v63  ;;  %v267_v46 = vpop.f32.mrb[21].mxu0  ;;  %1675 = vmatprep.mubr.bf16.mxu1 %v446_v39 }
 0x107   :  { %v1868_v47 = vpop.eup %1867  ;;  %v393_v48 = vadd.f32 1.0, %v1866_v43  ;;  %v268_v49 = vadd.f32 %v2239_v63, %v267_v46  ;;  %v1642_v50 = vpop.f32.mrb[22].mxu0  ;;  %1676 = vmatmul.mubr.bf16.gmra.mrb[8].mxu1 %v447_v37  ;;  %v424_v55 = vmul.f32 0.5, %v392_v41 }
 0x108   :  { %v391_v51 = vadd.f32 1.0, %v1868_v47  ;;  %v336_v52 = vmul.f32 0.5, %v276_v45  ;;  %v279_v53 = vadd.f32 %v1642_v50, %v2239_v63  ;;  %v270_v54 = vpop.f32.mrb[23].mxu0  ;;  %v422_v59 = vmul.f32 0.5, %v390_v44 }
 0x109   :  { %v425_v56 = vmul.f32 0.5, %v393_v48  ;;  %v334_v57 = vmul.f32 0.5, %v268_v49  ;;  %v271_v58 = vadd.f32 %v2239_v63, %v270_v54 }
 0x10a   :  { %v423_v60 = vmul.f32 0.5, %v391_v51  ;;  %1877 = vtanh.f32 %v336_v52  ;;  %v337_v61 = vmul.f32 0.5, %v279_v53 }
 0x10b   :  { %1879 = vtanh.f32 %v334_v57  ;;  %v335_v62 = vmul.f32 0.5, %v271_v58  ;;  %v449_v0 = vpack.c.bf16 %v425_v56, %v424_v55 }
 0x10c   :  { %v1870_v1 = vpop.eup %1869  ;;  %1881 = vtanh.f32 %v337_v61  ;;  %v448_v2 = vpack.c.bf16 %v423_v60, %v422_v59 }
 0x10d   :  { %v1872_v3 = vpop.eup %1871  ;;  %v396_v4 = vadd.f32 1.0, %v1870_v1  ;;  %1883 = vtanh.f32 %v335_v62  ;;  %v1645_v5 = vpop.f32.mrb[24].mxu0 }
 0x10e   :  { %v1874_v6 = vpop.eup %1873  ;;  %v394_v7 = vadd.f32 1.0, %v1872_v3  ;;  %v292_v8 = vadd.f32 %v1645_v5, %v2239_v63  ;;  %v283_v9 = vpop.f32.mrb[25].mxu0  ;;  %1679 = vmatprep.mubr.bf16.mxu1 %v448_v2 }
 0x10f   :  { %v1876_v10 = vpop.eup %1875  ;;  %v397_v11 = vadd.f32 1.0, %v1874_v6  ;;  %v284_v12 = vadd.f32 %v2239_v63, %v283_v9  ;;  %v1646_v13 = vpop.f32.mrb[26].mxu0  ;;  %1680 = vmatmul.mubr.bf16.gmra.mrb[12].mxu1 %v449_v0  ;;  %v428_v18 = vmul.f32 0.5, %v396_v4 }
 0x110   :  { %v395_v14 = vadd.f32 1.0, %v1876_v10  ;;  %v340_v15 = vmul.f32 0.5, %v292_v8  ;;  %v295_v16 = vadd.f32 %v1646_v13, %v2239_v63  ;;  %v286_v17 = vpop.f32.mrb[27].mxu0  ;;  %v426_v22 = vmul.f32 0.5, %v394_v7 }
 0x111   :  { %v429_v19 = vmul.f32 0.5, %v397_v11  ;;  %v338_v20 = vmul.f32 0.5, %v284_v12  ;;  %v287_v21 = vadd.f32 %v2239_v63, %v286_v17 }
 0x112   :  { %v427_v23 = vmul.f32 0.5, %v395_v14  ;;  %1885 = vtanh.f32 %v340_v15  ;;  %v341_v24 = vmul.f32 0.5, %v295_v16 }
 0x113   :  { %1887 = vtanh.f32 %v338_v20  ;;  %v339_v25 = vmul.f32 0.5, %v287_v21  ;;  %v451_v26 = vpack.c.bf16 %v429_v19, %v428_v18  ;;  %v1826_v18 = vld [vmem:[%s2572_s5 + $0x28] sm:$0xff]   ;;  %v1827_v19 = vld [vmem:[%s2572_s5 + $0x30] sm:$0xff]   ;;  %v1828_v20 = vld [vmem:[%s2572_s5 + $0x38] sm:$0xff]  }
 0x114   :  { %v1878_v27 = vpop.eup %1877  ;;  %1889 = vtanh.f32 %v341_v24  ;;  %v450_v28 = vpack.c.bf16 %v427_v23, %v426_v22  ;;  %1709 = vmatprep.subr.bf16.mxu0 %v1826_v18  ;;  %v2285_v21 = vld [vmem:[%s2574_s7] sm:$0xff]   ;;  %v2291_v22 = vld [vmem:[%s2574_s7 + $0x8] sm:$0xff]   ;;  %v2299_v23 = vld [vmem:[%s2574_s7 + $0x10] sm:$0xff]  }
 0x115   :  { %v1880_v29 = vpop.eup %1879  ;;  %v400_v30 = vadd.f32 1.0, %v1878_v27  ;;  %1891 = vtanh.f32 %v339_v25  ;;  %v1649_v31 = vpop.f32.mrb[28].mxu0  ;;  %1710 = vmatpush3.bf16.msra.mxu0 %v1826_v18  ;;  %1795 = vmatprep.subr.bf16.mxu1 %v2285_v21  ;;  %v2306_v24 = vld [vmem:[%s2574_s7 + $0x18] sm:$0xff]   ;;  %v2314_v25 = vld [vmem:[%s2575_s4] ss:$0 sm:$0xff] }
 0x116   :  { %v1882_v32 = vpop.eup %1881  ;;  %v398_v33 = vadd.f32 1.0, %v1880_v29  ;;  %v308_v34 = vadd.f32 %v1649_v31, %v2239_v63  ;;  %v299_v35 = vpop.f32.mrb[29].mxu0  ;;  %1683 = vmatprep.mubr.bf16.mxu1 %v450_v28  ;;  %1711 = vmatprep.subr.bf16.mxu0 %v1827_v19 }
 0x117   :  { %v1884_v36 = vpop.eup %1883  ;;  %v401_v37 = vadd.f32 1.0, %v1882_v32  ;;  %v300_v38 = vadd.f32 %v2239_v63, %v299_v35  ;;  %v1650_v39 = vpop.f32.mrb[30].mxu0  ;;  %1684 = vmatmul.mubr.bf16.gmra.mrb[16].mxu1 %v451_v26  ;;  %v432_v44 = vmul.f32 0.5, %v400_v30 }
 0x118   :  { %v399_v40 = vadd.f32 1.0, %v1884_v36  ;;  %v344_v41 = vmul.f32 0.5, %v308_v34  ;;  %v311_v42 = vadd.f32 %v1650_v39, %v2239_v63  ;;  %v302_v43 = vpop.f32.mrb[31].mxu0  ;;  %v430_v48 = vmul.f32 0.5, %v398_v33  ;;  %1803 = vmatpush3.bf16.msra.mxu1 %v2285_v21 }
 0x119   :  { %v433_v45 = vmul.f32 0.5, %v401_v37  ;;  %v342_v46 = vmul.f32 0.5, %v300_v38  ;;  %v303_v47 = vadd.f32 %v2239_v63, %v302_v43  ;;  %1712 = vmatpush3.bf16.msra.mxu0 %v1827_v19  ;;  %1796 = vmatprep.subr.bf16.mxu1 %v2291_v22 }
 0x11a   :  { %v431_v49 = vmul.f32 0.5, %v399_v40  ;;  %1893 = vtanh.f32 %v344_v41  ;;  %v345_v50 = vmul.f32 0.5, %v311_v42  ;;  %1713 = vmatprep.subr.bf16.mxu0 %v1828_v20 }
 0x11b   :  { %1895 = vtanh.f32 %v342_v46  ;;  %v343_v51 = vmul.f32 0.5, %v303_v47  ;;  %v453_v52 = vpack.c.bf16 %v433_v45, %v432_v44 }
 0x11c   :  { %v1886_v53 = vpop.eup %1885  ;;  %1897 = vtanh.f32 %v345_v50  ;;  %v452_v54 = vpack.c.bf16 %v431_v49, %v430_v48  ;;  %1804 = vmatpush3.bf16.msra.mxu1 %v2291_v22 }
 0x11d   :  { %v1888_v55 = vpop.eup %1887  ;;  %v404_v56 = vadd.f32 1.0, %v1886_v53  ;;  %1899 = vtanh.f32 %v343_v51  ;;  %1714 = vmatpush3.bf16.msra.mxu0 %v1828_v20  ;;  %1797 = vmatprep.subr.bf16.mxu1 %v2299_v23 }
 0x11e   :  { %v1890_v57 = vpop.eup %1889  ;;  %v402_v58 = vadd.f32 1.0, %v1888_v55  ;;  %1687 = vmatprep.mubr.bf16.mxu1 %v452_v54  ;;  %1747 = vmatprep.subr.bf16.mxu0 %v2285_v21 }
 0x11f   :  { %v1892_v59 = vpop.eup %1891  ;;  %v405_v60 = vadd.f32 1.0, %v1890_v57  ;;  %1688 = vmatmul.mubr.bf16.gmra.mrb[20].mxu1 %v453_v52  ;;  %v436_v61 = vmul.f32 0.5, %v404_v56 }
 0x120   :  { %v403_v63 = vadd.f32 1.0, %v1892_v59  ;;  %v434_v0 = vmul.f32 0.5, %v402_v58  ;;  %1805 = vmatpush3.bf16.msra.mxu1 %v2299_v23 }
 0x121   :  { %v437_v62 = vmul.f32 0.5, %v405_v60  ;;  %1798 = vmatprep.subr.bf16.mxu1 %v2306_v24 }
 0x122   :  { %v435_v1 = vmul.f32 0.5, %v403_v63 }
 0x123   :  { %v455_v2 = vpack.c.bf16 %v437_v62, %v436_v61 }
 0x124   :  { %v1894_v3 = vpop.eup %1893  ;;  %v454_v4 = vpack.c.bf16 %v435_v1, %v434_v0  ;;  %1806 = vmatpush3.bf16.msra.mxu1 %v2306_v24 }
 0x125   :  { %v1896_v5 = vpop.eup %1895  ;;  %v408_v6 = vadd.f32 1.0, %v1894_v3 }
 0x126   :  { %v1898_v7 = vpop.eup %1897  ;;  %v406_v8 = vadd.f32 1.0, %v1896_v5  ;;  %1691 = vmatprep.mubr.bf16.mxu1 %v454_v4 }
 0x127   :  { %v1900_v9 = vpop.eup %1899  ;;  %v409_v10 = vadd.f32 1.0, %v1898_v7  ;;  %1692 = vmatmul.mubr.bf16.gmra.mrb[24].mxu1 %v455_v2  ;;  %v440_v12 = vmul.f32 0.5, %v408_v6 }
 0x128   :  { %v407_v11 = vadd.f32 1.0, %v1900_v9  ;;  %v438_v14 = vmul.f32 0.5, %v406_v8 }
 0x129   :  { %v441_v13 = vmul.f32 0.5, %v409_v10 }
 0x12a   :  { %v439_v15 = vmul.f32 0.5, %v407_v11 }
 0x12b   :  { %v457_v16 = vpack.c.bf16 %v441_v13, %v440_v12 }
 0x12c   :  { %v456_v17 = vpack.c.bf16 %v439_v15, %v438_v14 }
 0x12e   :  { %1695 = vmatprep.mubr.bf16.mxu1 %v456_v17 }
 0x12f   :  { %1696 = vmatmul.mubr.bf16.gmra.mrb[28].mxu1 %v457_v16 }
 0x1ca   :  { %v1669_v26 = vpop.f32.mrb[0].mxu1 }
 0x1cb   :  { %v572_v27 = vadd.f32 %v1669_v26, %v2314_v25  ;;  %v563_v28 = vpop.f32.mrb[1].mxu1 }
 0x1cc   :  { %v564_v29 = vadd.f32 %v2314_v25, %v563_v28  ;;  %v1670_v30 = vpop.f32.mrb[2].mxu1 }
 0x1cd   :  { %v692_v31 = vmul.f32 0.5, %v572_v27  ;;  %v575_v32 = vadd.f32 %v1670_v30, %v2314_v25  ;;  %v566_v33 = vpop.f32.mrb[3].mxu1 }
 0x1ce   :  { %v690_v34 = vmul.f32 0.5, %v564_v29  ;;  %v567_v35 = vadd.f32 %v2314_v25, %v566_v33 }
 0x1cf   :  { %1901 = vtanh.f32 %v692_v31  ;;  %v693_v36 = vmul.f32 0.5, %v575_v32 }
 0x1d0   :  { %1903 = vtanh.f32 %v690_v34  ;;  %v691_v37 = vmul.f32 0.5, %v567_v35 }
 0x1d1   :  { %1905 = vtanh.f32 %v693_v36 }
 0x1d2   :  { %1907 = vtanh.f32 %v691_v37  ;;  %v1673_v38 = vpop.f32.mrb[4].mxu1 }
 0x1d3   :  { %v588_v39 = vadd.f32 %v1673_v38, %v2314_v25  ;;  %v579_v40 = vpop.f32.mrb[5].mxu1 }
 0x1d4   :  { %v580_v41 = vadd.f32 %v2314_v25, %v579_v40  ;;  %v1674_v42 = vpop.f32.mrb[6].mxu1 }
 0x1d5   :  { %v696_v43 = vmul.f32 0.5, %v588_v39  ;;  %v591_v44 = vadd.f32 %v1674_v42, %v2314_v25  ;;  %v582_v45 = vpop.f32.mrb[7].mxu1 }
 0x1d6   :  { %v694_v46 = vmul.f32 0.5, %v580_v41  ;;  %v583_v47 = vadd.f32 %v2314_v25, %v582_v45 }
 0x1d7   :  { %1909 = vtanh.f32 %v696_v43  ;;  %v697_v48 = vmul.f32 0.5, %v591_v44 }
 0x1d8   :  { %1911 = vtanh.f32 %v694_v46  ;;  %v695_v49 = vmul.f32 0.5, %v583_v47 }
 0x1d9   :  { %v1902_v50 = vpop.eup %1901  ;;  %1913 = vtanh.f32 %v697_v48 }
 0x1da   :  { %v1904_v51 = vpop.eup %1903  ;;  %v756_v52 = vadd.f32 1.0, %v1902_v50  ;;  %1915 = vtanh.f32 %v695_v49  ;;  %v1677_v53 = vpop.f32.mrb[8].mxu1 }
 0x1db   :  { %v1906_v54 = vpop.eup %1905  ;;  %v754_v55 = vadd.f32 1.0, %v1904_v51  ;;  %v604_v56 = vadd.f32 %v1677_v53, %v2314_v25  ;;  %v595_v57 = vpop.f32.mrb[9].mxu1 }
 0x1dc   :  { %v1908_v58 = vpop.eup %1907  ;;  %v757_v59 = vadd.f32 1.0, %v1906_v54  ;;  %v596_v60 = vadd.f32 %v2314_v25, %v595_v57  ;;  %v1678_v63 = vpop.f32.mrb[10].mxu1  ;;  %v788_v2 = vmul.f32 0.5, %v756_v52 }
 0x1dd   :  { %v755_v61 = vadd.f32 1.0, %v1908_v58  ;;  %v700_v62 = vmul.f32 0.5, %v604_v56  ;;  %v607_v0 = vadd.f32 %v1678_v63, %v2314_v25  ;;  %v598_v1 = vpop.f32.mrb[11].mxu1  ;;  %v786_v6 = vmul.f32 0.5, %v754_v55 }
 0x1de   :  { %v789_v3 = vmul.f32 0.5, %v757_v59  ;;  %v698_v4 = vmul.f32 0.5, %v596_v60  ;;  %v599_v5 = vadd.f32 %v2314_v25, %v598_v1 }
 0x1df   :  { %v787_v7 = vmul.f32 0.5, %v755_v61  ;;  %1917 = vtanh.f32 %v700_v62  ;;  %v701_v8 = vmul.f32 0.5, %v607_v0 }
 0x1e0   :  { %v819_v9 = vpack.c.bf16 %v789_v3, %v788_v2  ;;  %1919 = vtanh.f32 %v698_v4  ;;  %v699_v10 = vmul.f32 0.5, %v599_v5 }
 0x1e1   :  { %v1910_v11 = vpop.eup %1909  ;;  %1921 = vtanh.f32 %v701_v8  ;;  %v818_v12 = vpack.c.bf16 %v787_v7, %v786_v6 }
 0x1e2   :  { %v1912_v13 = vpop.eup %1911  ;;  %v760_v14 = vadd.f32 1.0, %v1910_v11  ;;  %1923 = vtanh.f32 %v699_v10  ;;  %v1681_v15 = vpop.f32.mrb[12].mxu1 }
 0x1e3   :  { %v1914_v16 = vpop.eup %1913  ;;  %v758_v17 = vadd.f32 1.0, %v1912_v13  ;;  %v620_v18 = vadd.f32 %v1681_v15, %v2314_v25  ;;  %v611_v19 = vpop.f32.mrb[13].mxu1  ;;  %1715 = vmatprep.mubr.bf16.mxu0 %v818_v12 }
 0x1e4   :  { %v1916_v20 = vpop.eup %1915  ;;  %v761_v26 = vadd.f32 1.0, %v1914_v16  ;;  %v612_v27 = vadd.f32 %v2314_v25, %v611_v19  ;;  %v1682_v28 = vpop.f32.mrb[14].mxu1  ;;  %1716 = vmatmul.mubr.bf16.vlgmr.msra.gmra.mrb[32].mxu0 %v819_v9  ;;  %v792_v33 = vmul.f32 0.5, %v760_v14 }
 0x1e5   :  { %v759_v29 = vadd.f32 1.0, %v1916_v20  ;;  %v704_v30 = vmul.f32 0.5, %v620_v18  ;;  %v623_v31 = vadd.f32 %v1682_v28, %v2314_v25  ;;  %v614_v32 = vpop.f32.mrb[15].mxu1  ;;  %1748 = vmatpush3.bf16.msra.mxu0 %v2285_v21  ;;  %v790_v37 = vmul.f32 0.5, %v758_v17 }
 0x1e6   :  { %v793_v34 = vmul.f32 0.5, %v761_v26  ;;  %v702_v35 = vmul.f32 0.5, %v612_v27  ;;  %v615_v36 = vadd.f32 %v2314_v25, %v614_v32  ;;  %1749 = vmatprep.subr.bf16.mxu0 %v2291_v22 }
 0x1e7   :  { %v791_v38 = vmul.f32 0.5, %v759_v29  ;;  %1925 = vtanh.f32 %v704_v30  ;;  %v705_v39 = vmul.f32 0.5, %v623_v31 }
 0x1e8   :  { %1927 = vtanh.f32 %v702_v35  ;;  %v703_v40 = vmul.f32 0.5, %v615_v36  ;;  %v821_v41 = vpack.c.bf16 %v793_v34, %v792_v33 }
 0x1e9   :  { %v1918_v42 = vpop.eup %1917  ;;  %1929 = vtanh.f32 %v705_v39  ;;  %v820_v43 = vpack.c.bf16 %v791_v38, %v790_v37  ;;  %1750 = vmatpush3.bf16.msra.mxu0 %v2291_v22 }
 0x1ea   :  { %v1920_v21 = vpop.eup %1919  ;;  %v764_v44 = vadd.f32 1.0, %v1918_v42  ;;  %1931 = vtanh.f32 %v703_v40  ;;  %v1685_v45 = vpop.f32.mrb[16].mxu1  ;;  %1751 = vmatprep.subr.bf16.mxu0 %v2299_v23 }
 0x1eb   :  { %v1922_v46 = vpop.eup %1921  ;;  %v762_v47 = vadd.f32 1.0, %v1920_v21  ;;  %v636_v48 = vadd.f32 %v1685_v45, %v2314_v25  ;;  %v627_v49 = vpop.f32.mrb[17].mxu1  ;;  %1719 = vmatprep.mubr.bf16.mxu0 %v820_v43 }
 0x1ec   :  { %v1924_v50 = vpop.eup %1923  ;;  %v765_v51 = vadd.f32 1.0, %v1922_v46  ;;  %v628_v52 = vadd.f32 %v2314_v25, %v627_v49  ;;  %v1686_v53 = vpop.f32.mrb[18].mxu1  ;;  %1720 = vmatmul.mubr.bf16.gmra.mrb[36].mxu0 %v821_v41  ;;  %v796_v57 = vmul.f32 0.5, %v764_v44 }
 0x1ed   :  { %v763_v54 = vadd.f32 1.0, %v1924_v50  ;;  %v708_v22 = vmul.f32 0.5, %v636_v48  ;;  %v639_v55 = vadd.f32 %v1686_v53, %v2314_v25  ;;  %v630_v56 = vpop.f32.mrb[19].mxu1  ;;  %1752 = vmatpush3.bf16.msra.mxu0 %v2299_v23  ;;  %v794_v63 = vmul.f32 0.5, %v762_v47 }
 0x1ee   :  { %v797_v58 = vmul.f32 0.5, %v765_v51  ;;  %v706_v59 = vmul.f32 0.5, %v628_v52  ;;  %v631_v60 = vadd.f32 %v2314_v25, %v630_v56  ;;  %1753 = vmatprep.subr.bf16.mxu0 %v2306_v24 }
 0x1ef   :  { %v795_v61 = vmul.f32 0.5, %v763_v54  ;;  %1933 = vtanh.f32 %v708_v22  ;;  %v709_v62 = vmul.f32 0.5, %v639_v55 }
 0x1f0   :  { %1935 = vtanh.f32 %v706_v59  ;;  %v707_v0 = vmul.f32 0.5, %v631_v60  ;;  %v823_v1 = vpack.c.bf16 %v797_v58, %v796_v57 }
 0x1f1   :  { %v1926_v2 = vpop.eup %1925  ;;  %1937 = vtanh.f32 %v709_v62  ;;  %v822_v3 = vpack.c.bf16 %v795_v61, %v794_v63  ;;  %1754 = vmatpush3.bf16.msra.mxu0 %v2306_v24 }
 0x1f2   :  { %v1928_v23 = vpop.eup %1927  ;;  %v768_v4 = vadd.f32 1.0, %v1926_v2  ;;  %1939 = vtanh.f32 %v707_v0  ;;  %v1689_v5 = vpop.f32.mrb[20].mxu1 }
 0x1f3   :  { %v1930_v6 = vpop.eup %1929  ;;  %v766_v7 = vadd.f32 1.0, %v1928_v23  ;;  %v652_v8 = vadd.f32 %v1689_v5, %v2314_v25  ;;  %v643_v9 = vpop.f32.mrb[21].mxu1  ;;  %1723 = vmatprep.mubr.bf16.mxu0 %v822_v3 }
 0x1f4   :  { %v1932_v10 = vpop.eup %1931  ;;  %v769_v11 = vadd.f32 1.0, %v1930_v6  ;;  %v644_v12 = vadd.f32 %v2314_v25, %v643_v9  ;;  %v1690_v13 = vpop.f32.mrb[22].mxu1  ;;  %1724 = vmatmul.mubr.bf16.gmra.mrb[40].mxu0 %v823_v1  ;;  %v800_v17 = vmul.f32 0.5, %v768_v4 }
 0x1f5   :  { %v767_v14 = vadd.f32 1.0, %v1932_v10  ;;  %v712_v15 = vmul.f32 0.5, %v652_v8  ;;  %v655_v24 = vadd.f32 %v1690_v13, %v2314_v25  ;;  %v646_v16 = vpop.f32.mrb[23].mxu1  ;;  %v798_v26 = vmul.f32 0.5, %v766_v7 }
 0x1f6   :  { %v801_v18 = vmul.f32 0.5, %v769_v11  ;;  %v710_v19 = vmul.f32 0.5, %v644_v12  ;;  %v647_v20 = vadd.f32 %v2314_v25, %v646_v16 }
 0x1f7   :  { %v799_v27 = vmul.f32 0.5, %v767_v14  ;;  %1941 = vtanh.f32 %v712_v15  ;;  %v713_v28 = vmul.f32 0.5, %v655_v24 }
 0x1f8   :  { %1943 = vtanh.f32 %v710_v19  ;;  %v711_v29 = vmul.f32 0.5, %v647_v20  ;;  %v825_v30 = vpack.c.bf16 %v801_v18, %v800_v17 }
 0x1f9   :  { %v1934_v31 = vpop.eup %1933  ;;  %1945 = vtanh.f32 %v713_v28  ;;  %v824_v32 = vpack.c.bf16 %v799_v27, %v798_v26 }
 0x1fa   :  { %v1936_v33 = vpop.eup %1935  ;;  %v772_v34 = vadd.f32 1.0, %v1934_v31  ;;  %1947 = vtanh.f32 %v711_v29  ;;  %v1693_v35 = vpop.f32.mrb[24].mxu1 }
 0x1fb   :  { %v1938_v36 = vpop.eup %1937  ;;  %v770_v37 = vadd.f32 1.0, %v1936_v33  ;;  %v668_v38 = vadd.f32 %v1693_v35, %v2314_v25  ;;  %v659_v39 = vpop.f32.mrb[25].mxu1  ;;  %1727 = vmatprep.mubr.bf16.mxu0 %v824_v32 }
 0x1fc   :  { %v1940_v40 = vpop.eup %1939  ;;  %v773_v41 = vadd.f32 1.0, %v1938_v36  ;;  %v660_v42 = vadd.f32 %v2314_v25, %v659_v39  ;;  %v1694_v43 = vpop.f32.mrb[26].mxu1  ;;  %1728 = vmatmul.mubr.bf16.gmra.mrb[44].mxu0 %v825_v30  ;;  %v804_v47 = vmul.f32 0.5, %v772_v34 }
 0x1fd   :  { %v771_v21 = vadd.f32 1.0, %v1940_v40  ;;  %v716_v44 = vmul.f32 0.5, %v668_v38  ;;  %v671_v45 = vadd.f32 %v1694_v43, %v2314_v25  ;;  %v662_v46 = vpop.f32.mrb[27].mxu1  ;;  %v802_v51 = vmul.f32 0.5, %v770_v37 }
 0x1fe   :  { %v805_v48 = vmul.f32 0.5, %v773_v41  ;;  %v714_v49 = vmul.f32 0.5, %v660_v42  ;;  %v663_v50 = vadd.f32 %v2314_v25, %v662_v46 }
 0x1ff   :  { %v803_v52 = vmul.f32 0.5, %v771_v21  ;;  %1949 = vtanh.f32 %v716_v44  ;;  %v717_v53 = vmul.f32 0.5, %v671_v45 }
 0x200   :  { %1951 = vtanh.f32 %v714_v49  ;;  %v715_v54 = vmul.f32 0.5, %v663_v50  ;;  %v827_v22 = vpack.c.bf16 %v805_v48, %v804_v47  ;;  %v1833_v47 = vld [vmem:[%s2574_s7 + $0x20] sm:$0xff]   ;;  %v1834_v48 = vld [vmem:[%s2574_s7 + $0x28] sm:$0xff]   ;;  %v1835_v49 = vld [vmem:[%s2574_s7 + $0x30] sm:$0xff]  }
 0x201   :  { %v1942_v55 = vpop.eup %1941  ;;  %1953 = vtanh.f32 %v717_v53  ;;  %v826_v56 = vpack.c.bf16 %v803_v52, %v802_v51  ;;  %1799 = vmatprep.subr.bf16.mxu1 %v1833_v47  ;;  %1755 = vmatprep.subr.bf16.mxu0 %v1833_v47  ;;  %v1836_v50 = vld [vmem:[%s2574_s7 + $0x38] sm:$0xff]   ;;  %v2370_v51 = vld [vmem:[%s2576_s6] ss:$0 sm:$0xff] }
 0x202   :  { %v1944_v57 = vpop.eup %1943  ;;  %v776_v58 = vadd.f32 1.0, %v1942_v55  ;;  %1955 = vtanh.f32 %v715_v54  ;;  %v1697_v59 = vpop.f32.mrb[28].mxu1  ;;  %1807 = vmatpush3.bf16.msra.mxu1 %v1833_v47  ;;  %1756 = vmatpush3.bf16.msra.mxu0 %v1833_v47 }
 0x203   :  { %v1946_v60 = vpop.eup %1945  ;;  %v774_v63 = vadd.f32 1.0, %v1944_v57  ;;  %v684_v61 = vadd.f32 %v1697_v59, %v2314_v25  ;;  %v675_v62 = vpop.f32.mrb[29].mxu1  ;;  %1731 = vmatprep.mubr.bf16.mxu0 %v826_v56  ;;  %1800 = vmatprep.subr.bf16.mxu1 %v1834_v48 }
 0x204   :  { %v1948_v0 = vpop.eup %1947  ;;  %v777_v1 = vadd.f32 1.0, %v1946_v60  ;;  %v676_v2 = vadd.f32 %v2314_v25, %v675_v62  ;;  %v1698_v3 = vpop.f32.mrb[30].mxu1  ;;  %1732 = vmatmul.mubr.bf16.gmra.mrb[48].mxu0 %v827_v22  ;;  %v808_v7 = vmul.f32 0.5, %v776_v58  ;;  %1757 = vmatprep.subr.bf16.mxu0 %v1834_v48 }
 0x205   :  { %v775_v23 = vadd.f32 1.0, %v1948_v0  ;;  %v720_v4 = vmul.f32 0.5, %v684_v61  ;;  %v687_v5 = vadd.f32 %v1698_v3, %v2314_v25  ;;  %v678_v6 = vpop.f32.mrb[31].mxu1  ;;  %v806_v11 = vmul.f32 0.5, %v774_v63 }
 0x206   :  { %v809_v8 = vmul.f32 0.5, %v777_v1  ;;  %v718_v9 = vmul.f32 0.5, %v676_v2  ;;  %v679_v10 = vadd.f32 %v2314_v25, %v678_v6  ;;  %1808 = vmatpush3.bf16.msra.mxu1 %v1834_v48  ;;  %1758 = vmatpush3.bf16.msra.mxu0 %v1834_v48 }
 0x207   :  { %v807_v12 = vmul.f32 0.5, %v775_v23  ;;  %1957 = vtanh.f32 %v720_v4  ;;  %v721_v13 = vmul.f32 0.5, %v687_v5  ;;  %1801 = vmatprep.subr.bf16.mxu1 %v1835_v49  ;;  %1759 = vmatprep.subr.bf16.mxu0 %v1835_v49 }
 0x208   :  { %1959 = vtanh.f32 %v718_v9  ;;  %v719_v14 = vmul.f32 0.5, %v679_v10  ;;  %v829_v15 = vpack.c.bf16 %v809_v8, %v808_v7 }
 0x209   :  { %v1950_v24 = vpop.eup %1949  ;;  %1961 = vtanh.f32 %v721_v13  ;;  %v828_v16 = vpack.c.bf16 %v807_v12, %v806_v11 }
 0x20a   :  { %v1952_v17 = vpop.eup %1951  ;;  %v780_v18 = vadd.f32 1.0, %v1950_v24  ;;  %1963 = vtanh.f32 %v719_v14  ;;  %1809 = vmatpush3.bf16.msra.mxu1 %v1835_v49  ;;  %1760 = vmatpush3.bf16.msra.mxu0 %v1835_v49 }
 0x20b   :  { %v1954_v19 = vpop.eup %1953  ;;  %v778_v20 = vadd.f32 1.0, %v1952_v17  ;;  %1735 = vmatprep.mubr.bf16.mxu0 %v828_v16  ;;  %1761 = vmatprep.subr.bf16.mxu0 %v1836_v50 }
 0x20c   :  { %v1956_v26 = vpop.eup %1955  ;;  %v781_v27 = vadd.f32 1.0, %v1954_v19  ;;  %1736 = vmatmul.mubr.bf16.gmra.mrb[52].mxu0 %v829_v15  ;;  %v812_v28 = vmul.f32 0.5, %v780_v18  ;;  %1802 = vmatprep.subr.bf16.mxu1 %v1836_v50 }
 0x20d   :  { %v779_v25 = vadd.f32 1.0, %v1956_v26  ;;  %v810_v30 = vmul.f32 0.5, %v778_v20 }
 0x20e   :  { %v813_v29 = vmul.f32 0.5, %v781_v27  ;;  %1762 = vmatpush3.bf16.msra.mxu0 %v1836_v50  ;;  %1810 = vmatpush3.bf16.msra.mxu1 %v1836_v50 }
 0x20f   :  { %v811_v31 = vmul.f32 0.5, %v779_v25 }
 0x210   :  { %v831_v32 = vpack.c.bf16 %v813_v29, %v812_v28 }
 0x211   :  { %v1958_v33 = vpop.eup %1957  ;;  %v830_v34 = vpack.c.bf16 %v811_v31, %v810_v30 }
 0x212   :  { %v1960_v35 = vpop.eup %1959  ;;  %v784_v36 = vadd.f32 1.0, %v1958_v33 }
 0x213   :  { %v1962_v37 = vpop.eup %1961  ;;  %v782_v38 = vadd.f32 1.0, %v1960_v35  ;;  %1739 = vmatprep.mubr.bf16.mxu0 %v830_v34 }
 0x214   :  { %v1964_v39 = vpop.eup %1963  ;;  %v785_v40 = vadd.f32 1.0, %v1962_v37  ;;  %1740 = vmatmul.mubr.bf16.gmra.mrb[56].mxu0 %v831_v32  ;;  %v816_v42 = vmul.f32 0.5, %v784_v36 }
 0x215   :  { %v783_v41 = vadd.f32 1.0, %v1964_v39  ;;  %v814_v21 = vmul.f32 0.5, %v782_v38 }
 0x216   :  { %v817_v43 = vmul.f32 0.5, %v785_v40 }
 0x217   :  { %v815_v44 = vmul.f32 0.5, %v783_v41 }
 0x218   :  { %v833_v45 = vpack.c.bf16 %v817_v43, %v816_v42 }
 0x219   :  { %v832_v46 = vpack.c.bf16 %v815_v44, %v814_v21 }
 0x21b   :  { %1743 = vmatprep.mubr.bf16.mxu0 %v832_v46 }
 0x21c   :  { %1744 = vmatmul.mubr.bf16.gmra.mrb[60].mxu0 %v833_v45 }
 0x2b7   :  { %v1717_v52 = vpop.f32.mrb[32].mxu0 }
 0x2b8   :  { %v948_v53 = vadd.f32 %v1717_v52, %v2370_v51  ;;  %v939_v54 = vpop.f32.mrb[33].mxu0 }
 0x2b9   :  { %v940_v22 = vadd.f32 %v2370_v51, %v939_v54  ;;  %v1718_v55 = vpop.f32.mrb[34].mxu0 }
 0x2ba   :  { %v1068_v56 = vmul.f32 0.5, %v948_v53  ;;  %v951_v57 = vadd.f32 %v1718_v55, %v2370_v51  ;;  %v942_v58 = vpop.f32.mrb[35].mxu0 }
 0x2bb   :  { %v1066_v59 = vmul.f32 0.5, %v940_v22  ;;  %v943_v60 = vadd.f32 %v2370_v51, %v942_v58 }
 0x2bc   :  { %1965 = vtanh.f32 %v1068_v56  ;;  %v1069_v63 = vmul.f32 0.5, %v951_v57 }
 0x2bd   :  { %1967 = vtanh.f32 %v1066_v59  ;;  %v1067_v61 = vmul.f32 0.5, %v943_v60 }
 0x2be   :  { %1969 = vtanh.f32 %v1069_v63 }
 0x2bf   :  { %1971 = vtanh.f32 %v1067_v61  ;;  %v1721_v62 = vpop.f32.mrb[36].mxu0 }
 0x2c0   :  { %v964_v0 = vadd.f32 %v1721_v62, %v2370_v51  ;;  %v955_v1 = vpop.f32.mrb[37].mxu0 }
 0x2c1   :  { %v956_v2 = vadd.f32 %v2370_v51, %v955_v1  ;;  %v1722_v3 = vpop.f32.mrb[38].mxu0 }
 0x2c2   :  { %v1072_v23 = vmul.f32 0.5, %v964_v0  ;;  %v967_v4 = vadd.f32 %v1722_v3, %v2370_v51  ;;  %v958_v5 = vpop.f32.mrb[39].mxu0 }
 0x2c3   :  { %v1070_v6 = vmul.f32 0.5, %v956_v2  ;;  %v959_v7 = vadd.f32 %v2370_v51, %v958_v5 }
 0x2c4   :  { %1973 = vtanh.f32 %v1072_v23  ;;  %v1073_v8 = vmul.f32 0.5, %v967_v4 }
 0x2c5   :  { %1975 = vtanh.f32 %v1070_v6  ;;  %v1071_v9 = vmul.f32 0.5, %v959_v7 }
 0x2c6   :  { %v1966_v10 = vpop.eup %1965  ;;  %1977 = vtanh.f32 %v1073_v8 }
 0x2c7   :  { %v1968_v11 = vpop.eup %1967  ;;  %v1132_v12 = vadd.f32 1.0, %v1966_v10  ;;  %1979 = vtanh.f32 %v1071_v9  ;;  %v1725_v13 = vpop.f32.mrb[40].mxu0 }
 0x2c8   :  { %v1970_v14 = vpop.eup %1969  ;;  %v1130_v15 = vadd.f32 1.0, %v1968_v11  ;;  %v980_v24 = vadd.f32 %v1725_v13, %v2370_v51  ;;  %v971_v16 = vpop.f32.mrb[41].mxu0 }
 0x2c9   :  { %v1972_v17 = vpop.eup %1971  ;;  %v1133_v18 = vadd.f32 1.0, %v1970_v14  ;;  %v972_v19 = vadd.f32 %v2370_v51, %v971_v16  ;;  %v1726_v20 = vpop.f32.mrb[42].mxu0  ;;  %v1164_v29 = vmul.f32 0.5, %v1132_v12 }
 0x2ca   :  { %v1131_v26 = vadd.f32 1.0, %v1972_v17  ;;  %v1076_v27 = vmul.f32 0.5, %v980_v24  ;;  %v983_v25 = vadd.f32 %v1726_v20, %v2370_v51  ;;  %v974_v28 = vpop.f32.mrb[43].mxu0  ;;  %v1162_v33 = vmul.f32 0.5, %v1130_v15 }
 0x2cb   :  { %v1165_v30 = vmul.f32 0.5, %v1133_v18  ;;  %v1074_v31 = vmul.f32 0.5, %v972_v19  ;;  %v975_v32 = vadd.f32 %v2370_v51, %v974_v28 }
 0x2cc   :  { %v1163_v34 = vmul.f32 0.5, %v1131_v26  ;;  %1981 = vtanh.f32 %v1076_v27  ;;  %v1077_v35 = vmul.f32 0.5, %v983_v25 }
 0x2cd   :  { %v1195_v36 = vpack.c.bf16 %v1165_v30, %v1164_v29  ;;  %1983 = vtanh.f32 %v1074_v31  ;;  %v1075_v37 = vmul.f32 0.5, %v975_v32 }
 0x2ce   :  { %v1974_v38 = vpop.eup %1973  ;;  %1985 = vtanh.f32 %v1077_v35  ;;  %v1194_v39 = vpack.c.bf16 %v1163_v34, %v1162_v33 }
 0x2cf   :  { %v1976_v40 = vpop.eup %1975  ;;  %v1136_v41 = vadd.f32 1.0, %v1974_v38  ;;  %1987 = vtanh.f32 %v1075_v37  ;;  %v1729_v42 = vpop.f32.mrb[44].mxu0 }
 0x2d0   :  { %v1978_v43 = vpop.eup %1977  ;;  %v1134_v21 = vadd.f32 1.0, %v1976_v40  ;;  %v996_v44 = vadd.f32 %v1729_v42, %v2370_v51  ;;  %v987_v45 = vpop.f32.mrb[45].mxu0  ;;  %1763 = vmatprep.mubr.bf16.mxu0 %v1194_v39 }
 0x2d1   :  { %v1980_v46 = vpop.eup %1979  ;;  %v1137_v47 = vadd.f32 1.0, %v1978_v43  ;;  %v988_v48 = vadd.f32 %v2370_v51, %v987_v45  ;;  %v1730_v49 = vpop.f32.mrb[46].mxu0  ;;  %1764 = vmatmul.mubr.bf16.vlgmr.msra.gmra.mrb[64].mxu0 %v1195_v36  ;;  %v1168_v22 = vmul.f32 0.5, %v1136_v41 }
 0x2d2   :  { %v1135_v50 = vadd.f32 1.0, %v1980_v46  ;;  %v1080_v52 = vmul.f32 0.5, %v996_v44  ;;  %v999_v53 = vadd.f32 %v1730_v49, %v2370_v51  ;;  %v990_v54 = vpop.f32.mrb[47].mxu0  ;;  %v1166_v58 = vmul.f32 0.5, %v1134_v21 }
 0x2d3   :  { %v1169_v55 = vmul.f32 0.5, %v1137_v47  ;;  %v1078_v56 = vmul.f32 0.5, %v988_v48  ;;  %v991_v57 = vadd.f32 %v2370_v51, %v990_v54 }
 0x2d4   :  { %v1167_v59 = vmul.f32 0.5, %v1135_v50  ;;  %1989 = vtanh.f32 %v1080_v52  ;;  %v1081_v60 = vmul.f32 0.5, %v999_v53 }
 0x2d5   :  { %v1197_v63 = vpack.c.bf16 %v1169_v55, %v1168_v22  ;;  %1991 = vtanh.f32 %v1078_v56  ;;  %v1079_v61 = vmul.f32 0.5, %v991_v57 }
 0x2d6   :  { %v1982_v62 = vpop.eup %1981  ;;  %1993 = vtanh.f32 %v1081_v60  ;;  %v1196_v0 = vpack.c.bf16 %v1167_v59, %v1166_v58 }
 0x2d7   :  { %v1984_v1 = vpop.eup %1983  ;;  %v1140_v2 = vadd.f32 1.0, %v1982_v62  ;;  %1995 = vtanh.f32 %v1079_v61  ;;  %v1733_v3 = vpop.f32.mrb[48].mxu0 }
 0x2d8   :  { %v1986_v23 = vpop.eup %1985  ;;  %v1138_v4 = vadd.f32 1.0, %v1984_v1  ;;  %v1012_v5 = vadd.f32 %v1733_v3, %v2370_v51  ;;  %v1003_v6 = vpop.f32.mrb[49].mxu0  ;;  %1767 = vmatprep.mubr.bf16.mxu1 %v1196_v0 }
 0x2d9   :  { %v1988_v7 = vpop.eup %1987  ;;  %v1141_v8 = vadd.f32 1.0, %v1986_v23  ;;  %v1004_v9 = vadd.f32 %v2370_v51, %v1003_v6  ;;  %v1734_v10 = vpop.f32.mrb[50].mxu0  ;;  %1768 = vmatmul.mubr.bf16.vlgmr.msra.gmra.mrb[32].mxu1 %v1197_v63  ;;  %v1172_v15 = vmul.f32 0.5, %v1140_v2 }
 0x2da   :  { %v1139_v11 = vadd.f32 1.0, %v1988_v7  ;;  %v1084_v12 = vmul.f32 0.5, %v1012_v5  ;;  %v1015_v13 = vadd.f32 %v1734_v10, %v2370_v51  ;;  %v1006_v14 = vpop.f32.mrb[51].mxu0  ;;  %v1170_v18 = vmul.f32 0.5, %v1138_v4 }
 0x2db   :  { %v1173_v24 = vmul.f32 0.5, %v1141_v8  ;;  %v1082_v16 = vmul.f32 0.5, %v1004_v9  ;;  %v1007_v17 = vadd.f32 %v2370_v51, %v1006_v14 }
 0x2dc   :  { %v1171_v19 = vmul.f32 0.5, %v1139_v11  ;;  %1997 = vtanh.f32 %v1084_v12  ;;  %v1085_v20 = vmul.f32 0.5, %v1015_v13 }
 0x2dd   :  { %1999 = vtanh.f32 %v1082_v16  ;;  %v1083_v26 = vmul.f32 0.5, %v1007_v17  ;;  %v1199_v27 = vpack.c.bf16 %v1173_v24, %v1172_v15 }
 0x2de   :  { %v1990_v25 = vpop.eup %1989  ;;  %2001 = vtanh.f32 %v1085_v20  ;;  %v1198_v28 = vpack.c.bf16 %v1171_v19, %v1170_v18 }
 0x2df   :  { %v1992_v29 = vpop.eup %1991  ;;  %v1144_v30 = vadd.f32 1.0, %v1990_v25  ;;  %2003 = vtanh.f32 %v1083_v26  ;;  %v1737_v31 = vpop.f32.mrb[52].mxu0 }
 0x2e0   :  { %v1994_v32 = vpop.eup %1993  ;;  %v1142_v33 = vadd.f32 1.0, %v1992_v29  ;;  %v1028_v34 = vadd.f32 %v1737_v31, %v2370_v51  ;;  %v1019_v35 = vpop.f32.mrb[53].mxu0  ;;  %1771 = vmatprep.mubr.bf16.mxu1 %v1198_v28 }
 0x2e1   :  { %v1996_v36 = vpop.eup %1995  ;;  %v1145_v37 = vadd.f32 1.0, %v1994_v32  ;;  %v1020_v38 = vadd.f32 %v2370_v51, %v1019_v35  ;;  %v1738_v39 = vpop.f32.mrb[54].mxu0  ;;  %1772 = vmatmul.mubr.bf16.gmra.mrb[36].mxu1 %v1199_v27  ;;  %v1176_v21 = vmul.f32 0.5, %v1144_v30 }
 0x2e2   :  { %v1143_v40 = vadd.f32 1.0, %v1996_v36  ;;  %v1088_v41 = vmul.f32 0.5, %v1028_v34  ;;  %v1031_v42 = vadd.f32 %v1738_v39, %v2370_v51  ;;  %v1022_v43 = vpop.f32.mrb[55].mxu0  ;;  %v1174_v47 = vmul.f32 0.5, %v1142_v33 }
 0x2e3   :  { %v1177_v44 = vmul.f32 0.5, %v1145_v37  ;;  %v1086_v45 = vmul.f32 0.5, %v1020_v38  ;;  %v1023_v46 = vadd.f32 %v2370_v51, %v1022_v43 }
 0x2e4   :  { %v1175_v48 = vmul.f32 0.5, %v1143_v40  ;;  %2005 = vtanh.f32 %v1088_v41  ;;  %v1089_v49 = vmul.f32 0.5, %v1031_v42 }
 0x2e5   :  { %2007 = vtanh.f32 %v1086_v45  ;;  %v1087_v50 = vmul.f32 0.5, %v1023_v46  ;;  %v1201_v52 = vpack.c.bf16 %v1177_v44, %v1176_v21 }
 0x2e6   :  { %v1998_v53 = vpop.eup %1997  ;;  %2009 = vtanh.f32 %v1089_v49  ;;  %v1200_v54 = vpack.c.bf16 %v1175_v48, %v1174_v47 }
 0x2e7   :  { %v2000_v22 = vpop.eup %1999  ;;  %v1148_v55 = vadd.f32 1.0, %v1998_v53  ;;  %2011 = vtanh.f32 %v1087_v50  ;;  %v1741_v56 = vpop.f32.mrb[56].mxu0 }
 0x2e8   :  { %v2002_v57 = vpop.eup %2001  ;;  %v1146_v58 = vadd.f32 1.0, %v2000_v22  ;;  %v1044_v59 = vadd.f32 %v1741_v56, %v2370_v51  ;;  %v1035_v60 = vpop.f32.mrb[57].mxu0  ;;  %1775 = vmatprep.mubr.bf16.mxu1 %v1200_v54 }
 0x2e9   :  { %v2004_v63 = vpop.eup %2003  ;;  %v1149_v61 = vadd.f32 1.0, %v2002_v57  ;;  %v1036_v62 = vadd.f32 %v2370_v51, %v1035_v60  ;;  %v1742_v0 = vpop.f32.mrb[58].mxu0  ;;  %1776 = vmatmul.mubr.bf16.gmra.mrb[40].mxu1 %v1201_v52  ;;  %v1180_v4 = vmul.f32 0.5, %v1148_v55 }
 0x2ea   :  { %v1147_v1 = vadd.f32 1.0, %v2004_v63  ;;  %v1092_v2 = vmul.f32 0.5, %v1044_v59  ;;  %v1047_v3 = vadd.f32 %v1742_v0, %v2370_v51  ;;  %v1038_v23 = vpop.f32.mrb[59].mxu0  ;;  %v1178_v8 = vmul.f32 0.5, %v1146_v58 }
 0x2eb   :  { %v1181_v5 = vmul.f32 0.5, %v1149_v61  ;;  %v1090_v6 = vmul.f32 0.5, %v1036_v62  ;;  %v1039_v7 = vadd.f32 %v2370_v51, %v1038_v23 }
 0x2ec   :  { %v1179_v9 = vmul.f32 0.5, %v1147_v1  ;;  %2013 = vtanh.f32 %v1092_v2  ;;  %v1093_v10 = vmul.f32 0.5, %v1047_v3 }
 0x2ed   :  { %2015 = vtanh.f32 %v1090_v6  ;;  %v1091_v11 = vmul.f32 0.5, %v1039_v7  ;;  %v1203_v12 = vpack.c.bf16 %v1181_v5, %v1180_v4  ;;  %v2407_v4 = vld [vmem:[%s2577_s8] ss:$0 sm:$0xff] }
 0x2ee   :  { %v2006_v13 = vpop.eup %2005  ;;  %2017 = vtanh.f32 %v1093_v10  ;;  %v1202_v14 = vpack.c.bf16 %v1179_v9, %v1178_v8 }
 0x2ef   :  { %v2008_v15 = vpop.eup %2007  ;;  %v1152_v24 = vadd.f32 1.0, %v2006_v13  ;;  %2019 = vtanh.f32 %v1091_v11  ;;  %v1745_v16 = vpop.f32.mrb[60].mxu0 }
 0x2f0   :  { %v2010_v17 = vpop.eup %2009  ;;  %v1150_v18 = vadd.f32 1.0, %v2008_v15  ;;  %v1060_v19 = vadd.f32 %v1745_v16, %v2370_v51  ;;  %v1051_v20 = vpop.f32.mrb[61].mxu0  ;;  %1779 = vmatprep.mubr.bf16.mxu1 %v1202_v14 }
 0x2f1   :  { %v2012_v26 = vpop.eup %2011  ;;  %v1153_v27 = vadd.f32 1.0, %v2010_v17  ;;  %v1052_v25 = vadd.f32 %v2370_v51, %v1051_v20  ;;  %v1746_v28 = vpop.f32.mrb[62].mxu0  ;;  %1780 = vmatmul.mubr.bf16.gmra.mrb[44].mxu1 %v1203_v12  ;;  %v1184_v33 = vmul.f32 0.5, %v1152_v24 }
 0x2f2   :  { %v1151_v29 = vadd.f32 1.0, %v2012_v26  ;;  %v1096_v30 = vmul.f32 0.5, %v1060_v19  ;;  %v1063_v31 = vadd.f32 %v1746_v28, %v2370_v51  ;;  %v1054_v32 = vpop.f32.mrb[63].mxu0  ;;  %v1182_v37 = vmul.f32 0.5, %v1150_v18 }
 0x2f3   :  { %v1185_v34 = vmul.f32 0.5, %v1153_v27  ;;  %v1094_v35 = vmul.f32 0.5, %v1052_v25  ;;  %v1055_v36 = vadd.f32 %v2370_v51, %v1054_v32 }
 0x2f4   :  { %v1183_v38 = vmul.f32 0.5, %v1151_v29  ;;  %2021 = vtanh.f32 %v1096_v30  ;;  %v1097_v39 = vmul.f32 0.5, %v1063_v31 }
 0x2f5   :  { %2023 = vtanh.f32 %v1094_v35  ;;  %v1095_v40 = vmul.f32 0.5, %v1055_v36  ;;  %v1205_v41 = vpack.c.bf16 %v1185_v34, %v1184_v33 }
 0x2f6   :  { %v2014_v42 = vpop.eup %2013  ;;  %2025 = vtanh.f32 %v1097_v39  ;;  %v1204_v43 = vpack.c.bf16 %v1183_v38, %v1182_v37 }
 0x2f7   :  { %v2016_v21 = vpop.eup %2015  ;;  %v1156_v44 = vadd.f32 1.0, %v2014_v42  ;;  %2027 = vtanh.f32 %v1095_v40 }
 0x2f8   :  { %v2018_v45 = vpop.eup %2017  ;;  %v1154_v46 = vadd.f32 1.0, %v2016_v21  ;;  %1783 = vmatprep.mubr.bf16.mxu1 %v1204_v43 }
 0x2f9   :  { %v2020_v47 = vpop.eup %2019  ;;  %v1157_v48 = vadd.f32 1.0, %v2018_v45  ;;  %1784 = vmatmul.mubr.bf16.gmra.mrb[48].mxu1 %v1205_v41  ;;  %v1188_v49 = vmul.f32 0.5, %v1156_v44 }
 0x2fa   :  { %v1155_v51 = vadd.f32 1.0, %v2020_v47  ;;  %v1186_v52 = vmul.f32 0.5, %v1154_v46 }
 0x2fb   :  { %v1189_v50 = vmul.f32 0.5, %v1157_v48 }
 0x2fc   :  { %v1187_v53 = vmul.f32 0.5, %v1155_v51 }
 0x2fd   :  { %v1207_v54 = vpack.c.bf16 %v1189_v50, %v1188_v49 }
 0x2fe   :  { %v2022_v22 = vpop.eup %2021  ;;  %v1206_v55 = vpack.c.bf16 %v1187_v53, %v1186_v52 }
 0x2ff   :  { %v2024_v56 = vpop.eup %2023  ;;  %v1160_v57 = vadd.f32 1.0, %v2022_v22 }
 0x300   :  { %v2026_v58 = vpop.eup %2025  ;;  %v1158_v59 = vadd.f32 1.0, %v2024_v56  ;;  %1787 = vmatprep.mubr.bf16.mxu1 %v1206_v55 }
 0x301   :  { %v2028_v60 = vpop.eup %2027  ;;  %v1161_v63 = vadd.f32 1.0, %v2026_v58  ;;  %1788 = vmatmul.mubr.bf16.gmra.mrb[52].mxu1 %v1207_v54  ;;  %v1192_v62 = vmul.f32 0.5, %v1160_v57 }
 0x302   :  { %v1159_v61 = vadd.f32 1.0, %v2028_v60  ;;  %v1190_v1 = vmul.f32 0.5, %v1158_v59 }
 0x303   :  { %v1193_v0 = vmul.f32 0.5, %v1161_v63 }
 0x304   :  { %v1191_v2 = vmul.f32 0.5, %v1159_v61 }
 0x305   :  { %v1209_v3 = vpack.c.bf16 %v1193_v0, %v1192_v62 }
 0x306   :  { %v1208_v23 = vpack.c.bf16 %v1191_v2, %v1190_v1 }
 0x308   :  { %1791 = vmatprep.mubr.bf16.mxu1 %v1208_v23 }
 0x309   :  { %1792 = vmatmul.mubr.bf16.gmra.mrb[56].mxu1 %v1209_v3 }
 0x3a4   :  { %v1765_v5 = vpop.f32.mrb[64].mxu0 }
 0x3a5   :  { %v1324_v6 = vadd.f32 %v1765_v5, %v2407_v4  ;;  %v1315_v7 = vpop.f32.mrb[65].mxu0 }
 0x3a6   :  { %v1316_v8 = vadd.f32 %v2407_v4, %v1315_v7  ;;  %v1766_v9 = vpop.f32.mrb[66].mxu0 }
 0x3a7   :  { %1445 = vst.msk [vmem:[%s2578_s9 + $0x10] sm:$0xff] %vm1442_vm1, %v1324_v6  ;;  %v1327_v10 = vadd.f32 %v1766_v9, %v2407_v4  ;;  %v1318_v11 = vpop.f32.mrb[67].mxu0 }
 0x3a8   :  { %1443 = vst.msk [vmem:[%s2578_s9] sm:$0xff] %vm1442_vm1, %v1316_v8  ;;  %v1319_v12 = vadd.f32 %v2407_v4, %v1318_v11 }
 0x3a9   :  { %1446 = vst.msk [vmem:[%s2578_s9 + $0x18] sm:$0xff] %vm1442_vm1, %v1327_v10 }
 0x3aa   :  { %1444 = vst.msk [vmem:[%s2578_s9 + $0x8] sm:$0xff] %vm1442_vm1, %v1319_v12 }
 0x3ac   :  { %v1769_v13 = vpop.f32.mrb[32].mxu1 }
 0x3ad   :  { %v1340_v14 = vadd.f32 %v1769_v13, %v2407_v4  ;;  %v1331_v15 = vpop.f32.mrb[33].mxu1 }
 0x3ae   :  { %v1332_v24 = vadd.f32 %v2407_v4, %v1331_v15  ;;  %v1770_v16 = vpop.f32.mrb[34].mxu1 }
 0x3af   :  { %1449 = vst.msk [vmem:[%s2578_s9 + $0x30] sm:$0xff] %vm1442_vm1, %v1340_v14  ;;  %v1343_v17 = vadd.f32 %v1770_v16, %v2407_v4  ;;  %v1334_v18 = vpop.f32.mrb[35].mxu1 }
 0x3b0   :  { %1447 = vst.msk [vmem:[%s2578_s9 + $0x20] sm:$0xff] %vm1442_vm1, %v1332_v24  ;;  %v1335_v19 = vadd.f32 %v2407_v4, %v1334_v18 }
 0x3b1   :  { %1450 = vst.msk [vmem:[%s2578_s9 + $0x38] sm:$0xff] %vm1442_vm1, %v1343_v17 }
 0x3b2   :  { %1448 = vst.msk [vmem:[%s2578_s9 + $0x28] sm:$0xff] %vm1442_vm1, %v1335_v19 }
 0x3b4   :  { %v1773_v20 = vpop.f32.mrb[36].mxu1 }
 0x3b5   :  { %v1356_v26 = vadd.f32 %v1773_v20, %v2407_v4  ;;  %v1347_v27 = vpop.f32.mrb[37].mxu1 }
 0x3b6   :  { %v1348_v25 = vadd.f32 %v2407_v4, %v1347_v27  ;;  %v1774_v28 = vpop.f32.mrb[38].mxu1 }
 0x3b7   :  { %1453 = vst.msk [vmem:[%s2578_s9 + $0x50] sm:$0xff] %vm1442_vm1, %v1356_v26  ;;  %v1359_v29 = vadd.f32 %v1774_v28, %v2407_v4  ;;  %v1350_v30 = vpop.f32.mrb[39].mxu1 }
 0x3b8   :  { %1451 = vst.msk [vmem:[%s2578_s9 + $0x40] sm:$0xff] %vm1442_vm1, %v1348_v25  ;;  %v1351_v31 = vadd.f32 %v2407_v4, %v1350_v30 }
 0x3b9   :  { %1454 = vst.msk [vmem:[%s2578_s9 + $0x58] sm:$0xff] %vm1442_vm1, %v1359_v29 }
 0x3ba   :  { %1452 = vst.msk [vmem:[%s2578_s9 + $0x48] sm:$0xff] %vm1442_vm1, %v1351_v31 }
 0x3bc   :  { %v1777_v32 = vpop.f32.mrb[40].mxu1 }
 0x3bd   :  { %v1372_v33 = vadd.f32 %v1777_v32, %v2407_v4  ;;  %v1363_v34 = vpop.f32.mrb[41].mxu1 }
 0x3be   :  { %v1364_v35 = vadd.f32 %v2407_v4, %v1363_v34  ;;  %v1778_v36 = vpop.f32.mrb[42].mxu1 }
 0x3bf   :  { %1457 = vst.msk [vmem:[%s2578_s9 + $0x70] sm:$0xff] %vm1442_vm1, %v1372_v33  ;;  %v1375_v37 = vadd.f32 %v1778_v36, %v2407_v4  ;;  %v1366_v38 = vpop.f32.mrb[43].mxu1 }
 0x3c0   :  { %1455 = vst.msk [vmem:[%s2578_s9 + $0x60] sm:$0xff] %vm1442_vm1, %v1364_v35  ;;  %v1367_v39 = vadd.f32 %v2407_v4, %v1366_v38 }
 0x3c1   :  { %1458 = vst.msk [vmem:[%s2578_s9 + $0x78] sm:$0xff] %vm1442_vm1, %v1375_v37 }
 0x3c2   :  { %1456 = vst.msk [vmem:[%s2578_s9 + $0x68] sm:$0xff] %vm1442_vm1, %v1367_v39 }
 0x3c4   :  { %v1781_v40 = vpop.f32.mrb[44].mxu1 }
 0x3c5   :  { %v1388_v41 = vadd.f32 %v1781_v40, %v2407_v4  ;;  %v1379_v42 = vpop.f32.mrb[45].mxu1 }
 0x3c6   :  { %v1380_v43 = vadd.f32 %v2407_v4, %v1379_v42  ;;  %v1782_v21 = vpop.f32.mrb[46].mxu1 }
 0x3c7   :  { %1461 = vst.msk [vmem:[%s2578_s9 + $0x90] sm:$0xff] %vm1442_vm1, %v1388_v41  ;;  %v1391_v44 = vadd.f32 %v1782_v21, %v2407_v4  ;;  %v1382_v45 = vpop.f32.mrb[47].mxu1 }
 0x3c8   :  { %1459 = vst.msk [vmem:[%s2578_s9 + $0x80] sm:$0xff] %vm1442_vm1, %v1380_v43  ;;  %v1383_v46 = vadd.f32 %v2407_v4, %v1382_v45 }
 0x3c9   :  { %1462 = vst.msk [vmem:[%s2578_s9 + $0x98] sm:$0xff] %vm1442_vm1, %v1391_v44 }
 0x3ca   :  { %1460 = vst.msk [vmem:[%s2578_s9 + $0x88] sm:$0xff] %vm1442_vm1, %v1383_v46 }
 0x3cc   :  { %v1785_v47 = vpop.f32.mrb[48].mxu1 }
 0x3cd   :  { %v1404_v48 = vadd.f32 %v1785_v47, %v2407_v4  ;;  %v1395_v51 = vpop.f32.mrb[49].mxu1 }
 0x3ce   :  { %v1396_v49 = vadd.f32 %v2407_v4, %v1395_v51  ;;  %v1786_v50 = vpop.f32.mrb[50].mxu1 }
 0x3cf   :  { %1465 = vst.msk [vmem:[%s2578_s9 + $0xb0] sm:$0xff] %vm1442_vm1, %v1404_v48  ;;  %v1407_v52 = vadd.f32 %v1786_v50, %v2407_v4  ;;  %v1398_v53 = vpop.f32.mrb[51].mxu1 }
 0x3d0   :  { %1463 = vst.msk [vmem:[%s2578_s9 + $0xa0] sm:$0xff] %vm1442_vm1, %v1396_v49  ;;  %v1399_v54 = vadd.f32 %v2407_v4, %v1398_v53 }
 0x3d1   :  { %1466 = vst.msk [vmem:[%s2578_s9 + $0xb8] sm:$0xff] %vm1442_vm1, %v1407_v52 }
 0x3d2   :  { %1464 = vst.msk [vmem:[%s2578_s9 + $0xa8] sm:$0xff] %vm1442_vm1, %v1399_v54 }
 0x3d4   :  { %v1789_v22 = vpop.f32.mrb[52].mxu1 }
 0x3d5   :  { %v1420_v55 = vadd.f32 %v1789_v22, %v2407_v4  ;;  %v1411_v56 = vpop.f32.mrb[53].mxu1 }
 0x3d6   :  { %v1412_v57 = vadd.f32 %v2407_v4, %v1411_v56  ;;  %v1790_v58 = vpop.f32.mrb[54].mxu1 }
 0x3d7   :  { %1469 = vst.msk [vmem:[%s2578_s9 + $0xd0] sm:$0xff] %vm1442_vm1, %v1420_v55  ;;  %v1423_v59 = vadd.f32 %v1790_v58, %v2407_v4  ;;  %v1414_v60 = vpop.f32.mrb[55].mxu1 }
 0x3d8   :  { %1467 = vst.msk [vmem:[%s2578_s9 + $0xc0] sm:$0xff] %vm1442_vm1, %v1412_v57  ;;  %v1415_v63 = vadd.f32 %v2407_v4, %v1414_v60 }
 0x3d9   :  { %1470 = vst.msk [vmem:[%s2578_s9 + $0xd8] sm:$0xff] %vm1442_vm1, %v1423_v59 }
 0x3da   :  { %1468 = vst.msk [vmem:[%s2578_s9 + $0xc8] sm:$0xff] %vm1442_vm1, %v1415_v63 }
 0x3dc   :  { %v1793_v61 = vpop.f32.mrb[56].mxu1 }
 0x3dd   :  { %v1436_v62 = vadd.f32 %v1793_v61, %v2407_v4  ;;  %v1427_v0 = vpop.f32.mrb[57].mxu1 }
 0x3de   :  { %v1428_v1 = vadd.f32 %v2407_v4, %v1427_v0  ;;  %v1794_v2 = vpop.f32.mrb[58].mxu1 }
 0x3df   :  { %1473 = vst.msk [vmem:[%s2578_s9 + $0xf0] sm:$0xff] %vm1442_vm1, %v1436_v62  ;;  %v1439_v3 = vadd.f32 %v1794_v2, %v2407_v4  ;;  %v1430_v23 = vpop.f32.mrb[59].mxu1 }
 0x3e0   :  { %1471 = vst.msk [vmem:[%s2578_s9 + $0xe0] sm:$0xff] %vm1442_vm1, %v1428_v1  ;;  %v1431_v5 = vadd.f32 %v2407_v4, %v1430_v23 }
 0x3e1   :  { %1474 = vst.msk [vmem:[%s2578_s9 + $0xf8] sm:$0xff] %vm1442_vm1, %v1439_v3 }
 0x3e2   :  { %1472 = vst.msk [vmem:[%s2578_s9 + $0xe8] sm:$0xff] %vm1442_vm1, %v1431_v5 }

</bundles_post_ra>
